<compile_context>
chip_gen: v6e
topology: v6e:2x2x1
jax: 0.10.0
libtpu: 0.0.40
codegen_flags: <defaults>
</compile_context>

<pallas_src>
import math
import functools

import jax
import jax.numpy as jnp
from jax import lax
from jax.experimental import pallas as pl
from jax.experimental.pallas import tpu as pltpu

NEG_BIG = float(-(2 ** 63))   # matches torch's (-sys.maxsize - 1) additive mask value
LN_EPS = 1e-5                 # torch.nn.LayerNorm default

# MXU operand dtype: bf16 hits the v6e/v7x fast MXU path and halves weight/activation DMA.
# Accumulation is always f32; set to jnp.float32 for exact-f32 torch parity.
MXU_DTYPE = jnp.bfloat16
# approx reciprocal for the softmax denominator goes to the otherwise-idle EUP slot.
APPROX_RECIPROCAL = True
# Scoped-VMEM cap: above the v5e (16 MiB) / v6e,v7x (32 MiB) defaults, below v7x's 64 MiB physical.
VMEM_LIMIT = 48 * 1024 * 1024


def _pick_tile(dim, target, align):
    """Largest tile <= target that divides dim and is a multiple of `align`;
    falls back to the full dim (always a legal block size)."""
    if dim <= target:
        return dim
    t = (target // align) * align
    while t >= align:
        if dim % t == 0:
            return t
        t -= align
    return dim


# --------------------------------------------------------------------------
# Tiled linear (bias add), bf16 MXU operands, f32 accumulation
# --------------------------------------------------------------------------

def _linear_kernel(x_ref, w_ref, b_ref, o_ref, acc_ref):
    @pl.when(pl.program_id(2) == 0)
    def _init():
        acc_ref[...] = jnp.zeros_like(acc_ref)

    acc_ref[...] += jnp.dot(x_ref[...].astype(MXU_DTYPE), w_ref[...].astype(MXU_DTYPE),
                            preferred_element_type=jnp.float32)

    @pl.when(pl.program_id(2) == pl.num_programs(2) - 1)
    def _finalize():
        o_ref[...] = (acc_ref[...] + b_ref[...]).astype(o_ref.dtype)


def linear(x2d, w, b, out_dtype=None):
    """y = x2d @ w + b, tiled + BlockSpec double-buffered."""
    M, K = x2d.shape
    N = w.shape[1]
    out_dtype = x2d.dtype if out_dtype is None else out_dtype
    tm = _pick_tile(M, 256, 8)
    tn = _pick_tile(N, 512, 128)
    tk = _pick_tile(K, 512, 128)
    bytes_acc = (M * K * x2d.dtype.itemsize + K * N * w.dtype.itemsize
                 + N * 4 + M * N * jnp.dtype(out_dtype).itemsize)
    return pl.pallas_call(
        _linear_kernel,
        grid=(M // tm, N // tn, K // tk),
        in_specs=[
            pl.BlockSpec((tm, tk), lambda i, j, k: (i, k)),
            pl.BlockSpec((tk, tn), lambda i, j, k: (k, j)),
            pl.BlockSpec((1, tn), lambda i, j, k: (0, j)),
        ],
        out_specs=pl.BlockSpec((tm, tn), lambda i, j, k: (i, j)),
        out_shape=jax.ShapeDtypeStruct((M, N), out_dtype),
        scratch_shapes=[pltpu.VMEM((tm, tn), jnp.float32)],
        compiler_params=pltpu.CompilerParams(
            dimension_semantics=("parallel", "parallel", "arbitrary"),
            vmem_limit_bytes=VMEM_LIMIT),
        cost_estimate=pl.CostEstimate(flops=2 * M * N * K, transcendentals=0,
                                      bytes_accessed=bytes_acc),
    )(x2d, w, b.reshape(1, N))


# --------------------------------------------------------------------------
# Linear + bias + residual-add + LayerNorm fused (the wo projections)
# --------------------------------------------------------------------------

def _linear_res_ln_kernel(x_ref, w_ref, b_ref, r_ref, g_ref, beta_ref, o_ref, acc_ref):
    @pl.when(pl.program_id(1) == 0)
    def _init():
        acc_ref[...] = jnp.zeros_like(acc_ref)

    acc_ref[...] += jnp.dot(x_ref[...].astype(MXU_DTYPE), w_ref[...].astype(MXU_DTYPE),
                            preferred_element_type=jnp.float32)

    @pl.when(pl.program_id(1) == pl.num_programs(1) - 1)
    def _finalize():
        y = acc_ref[...] + b_ref[...] + r_ref[...].astype(jnp.float32)
        mean = jnp.mean(y, axis=-1, keepdims=True)
        var = jnp.mean((y - mean) ** 2, axis=-1, keepdims=True)   # biased var (torch LN)
        o_ref[...] = ((y - mean) * lax.rsqrt(var + LN_EPS) * g_ref[...]
                      + beta_ref[...]).astype(o_ref.dtype)


def linear_residual_layernorm(x2d, w, b, residual2d, gamma, beta):
    """LayerNorm((x2d @ w + b) + residual2d); output kept in f32 for the next residual path."""
    M, K = x2d.shape
    D = w.shape[1]
    tm = _pick_tile(M, 256, 8)
    tk = _pick_tile(K, 512, 128)
    # TODO(synk): for very large D, N-tile with a two-pass/Welford LayerNorm instead of full-D blocks.
    bytes_acc = (M * K * x2d.dtype.itemsize + K * D * w.dtype.itemsize
                 + M * D * residual2d.dtype.itemsize + M * D * 4 + 3 * D * 4)
    return pl.pallas_call(
        _linear_res_ln_kernel,
        grid=(M // tm, K // tk),
        in_specs=[
            pl.BlockSpec((tm, tk), lambda i, k: (i, k)),
            pl.BlockSpec((tk, D), lambda i, k: (k, 0)),
            pl.BlockSpec((1, D), lambda i, k: (0, 0)),
            pl.BlockSpec((tm, D), lambda i, k: (i, 0)),
            pl.BlockSpec((1, D), lambda i, k: (0, 0)),
            pl.BlockSpec((1, D), lambda i, k: (0, 0)),
        ],
        out_specs=pl.BlockSpec((tm, D), lambda i, k: (i, 0)),
        out_shape=jax.ShapeDtypeStruct((M, D), jnp.float32),
        scratch_shapes=[pltpu.VMEM((tm, D), jnp.float32)],
        compiler_params=pltpu.CompilerParams(
            dimension_semantics=("parallel", "arbitrary"),
            vmem_limit_bytes=VMEM_LIMIT),
        cost_estimate=pl.CostEstimate(flops=2 * M * D * K + 8 * M * D,
                                      transcendentals=M,
                                      bytes_accessed=bytes_acc),
    )(x2d, w, b.reshape(1, D), residual2d, gamma.reshape(1, D), beta.reshape(1, D))


# --------------------------------------------------------------------------
# Fused FFN, K-tiled along d_intermediate:
#   acc += gelu(x @ w1[:, j] + b1[j]) @ w2[j, :]  ;  finalize: + b2 + x -> LayerNorm
# The (tm, tdi) intermediate never touches HBM and neither FFN weight must be fully resident.
# --------------------------------------------------------------------------

def _ffn_res_ln_kernel(x_ref, w1_ref, b1_ref, w2_ref, b2_ref, g_ref, beta_ref, o_ref, acc_ref):
    @pl.when(pl.program_id(1) == 0)
    def _init():
        acc_ref[...] = jnp.zeros_like(acc_ref)

    x = x_ref[...].astype(jnp.float32)
    h = jnp.dot(x.astype(MXU_DTYPE), w1_ref[...].astype(MXU_DTYPE),
                preferred_element_type=jnp.float32) + b1_ref[...]
    # exact (erf) GELU — torch.nn.functional.gelu default.
    # TODO(synk): tanh-approx GELU (EUP slot) if tolerance allows.
    h = 0.5 * h * (1.0 + lax.erf(h * (1.0 / math.sqrt(2.0))))
    acc_ref[...] += jnp.dot(h.astype(MXU_DTYPE), w2_ref[...].astype(MXU_DTYPE),
                            preferred_element_type=jnp.float32)

    @pl.when(pl.program_id(1) == pl.num_programs(1) - 1)
    def _finalize():
        y = acc_ref[...] + b2_ref[...] + x                        # residual (= kernel input)
        mean = jnp.mean(y, axis=-1, keepdims=True)
        var = jnp.mean((y - mean) ** 2, axis=-1, keepdims=True)
        o_ref[...] = ((y - mean) * lax.rsqrt(var + LN_EPS) * g_ref[...]
                      + beta_ref[...]).astype(o_ref.dtype)


def ffn_residual_layernorm(x2d, w1, b1, w2, b2, gamma, beta):
    M, De = x2d.shape
    Di = w1.shape[1]
    tm = _pick_tile(M, 256, 8)
    tdi = _pick_tile(Di, 512, 128)
    bytes_acc = (M * De * x2d.dtype.itemsize + De * Di * w1.dtype.itemsize
                 + Di * De * w2.dtype.itemsize + M * De * 4 + (Di + 3 * De) * 4)
    return pl.pallas_call(
        _ffn_res_ln_kernel,
        grid=(M // tm, Di // tdi),
        in_specs=[
            pl.BlockSpec((tm, De), lambda i, j: (i, 0)),     # constant over j: fetched once
            pl.BlockSpec((De, tdi), lambda i, j: (0, j)),
            pl.BlockSpec((1, tdi), lambda i, j: (0, j)),
            pl.BlockSpec((tdi, De), lambda i, j: (j, 0)),
            pl.BlockSpec((1, De), lambda i, j: (0, 0)),
            pl.BlockSpec((1, De), lambda i, j: (0, 0)),
            pl.BlockSpec((1, De), lambda i, j: (0, 0)),
        ],
        out_specs=pl.BlockSpec((tm, De), lambda i, j: (i, 0)),
        out_shape=jax.ShapeDtypeStruct((M, De), jnp.float32),
        scratch_shapes=[pltpu.VMEM((tm, De), jnp.float32)],
        compiler_params=pltpu.CompilerParams(
            dimension_semantics=("parallel", "arbitrary"),
            vmem_limit_bytes=VMEM_LIMIT),
        cost_estimate=pl.CostEstimate(flops=4 * M * De * Di + 10 * M * De,
                                      transcendentals=M * Di,
                                      bytes_accessed=bytes_acc),
    )(x2d, w1, b1.reshape(1, Di), w2, b2.reshape(1, De),
      gamma.reshape(1, De), beta.reshape(1, De))


# --------------------------------------------------------------------------
# Attention core: head-batched, transpose-free einsums; grid (B, Lq/tq) both "parallel"
# --------------------------------------------------------------------------

def _attn_kernel(q_ref, k_ref, v_ref, m_ref, o_ref, s_ref, *, kv_len):
    q = q_ref[0]          # (H, tq, dk)  MXU_DTYPE
    k = k_ref[0]          # (H, Lk, dk)
    v = v_ref[0]          # (H, Lk, dk)
    # head-batched contraction over d_k — no per-head lane slicing, no explicit k.T
    scores = jnp.einsum('hqd,hkd->hqk', q, k, preferred_element_type=jnp.float32)
    # reference semantics: additive mask FIRST, then divide by sqrt(key_length)
    scores = (scores + m_ref[0][None]) * (1.0 / math.sqrt(kv_len))
    mx = jnp.max(scores, axis=-1, keepdims=True)
    p = jnp.exp(scores - mx)
    probs = p * pl.reciprocal(jnp.sum(p, axis=-1, keepdims=True),
                              approx=APPROX_RECIPROCAL)
    s_ref[0] = probs.astype(s_ref.dtype)                      # one (H, tq, Lk) store per step
    o_ref[0] = jnp.einsum('hqk,hkd->hqd', probs.astype(v.dtype), v,
                          preferred_element_type=jnp.float32).astype(o_ref.dtype)


def attention_core(q, k, v, mask_add):
    """q: (B,H,Lq,dk), k/v: (B,H,Lk,dk) in MXU_DTYPE; mask_add: (Bm, Lm, Lk) additive f32,
    Bm in {1, B}, Lm in {1, Lq}.  Returns blended (B,H,Lq,dk) and probs (B,H,Lq,Lk) f32."""
    B, H, Lq, dk = q.shape
    Lk = k.shape[2]
    Bm, Lm, _ = mask_add.shape
    tq = _pick_tile(Lq, 128, 8)

    q_idx = lambda b, qi: (b, 0, qi, 0)
    kv_idx = lambda b, qi: (b, 0, 0, 0)                 # constant over qi: K/V fetched once/batch
    m_idx = lambda b, qi: ((b if Bm > 1 else 0), (qi if Lm > 1 else 0), 0)
    m_block = (1, tq if Lm > 1 else 1, Lk)

    itm = q.dtype.itemsize
    bytes_acc = (B * H * (Lq + 2 * Lk) * dk * itm + Bm * Lm * Lk * 4
                 + B * H * Lq * dk * itm + B * H * Lq * Lk * 4)
    # TODO(synk): flash-style Lk tiling is omitted because the full probability tensor is a
    #             required output of the module; revisit if scores become optional.
    return pl.pallas_call(
        functools.partial(_attn_kernel, kv_len=Lk),
        grid=(B, Lq // tq),
        in_specs=[
            pl.BlockSpec((1, H, tq, dk), q_idx),
            pl.BlockSpec((1, H, Lk, dk), kv_idx),
            pl.BlockSpec((1, H, Lk, dk), kv_idx),
            pl.BlockSpec(m_block, m_idx),
        ],
        out_specs=[
            pl.BlockSpec((1, H, tq, dk), q_idx),
            pl.BlockSpec((1, H, tq, Lk), q_idx),
        ],
        out_shape=[
            jax.ShapeDtypeStruct((B, H, Lq, dk), q.dtype),
            jax.ShapeDtypeStruct((B, H, Lq, Lk), jnp.float32),   # TODO(synk): bf16 if tolerable
        ],
        compiler_params=pltpu.CompilerParams(
            dimension_semantics=("parallel", "parallel"),
            vmem_limit_bytes=VMEM_LIMIT),
        cost_estimate=pl.CostEstimate(flops=4 * B * H * Lq * Lk * dk,
                                      transcendentals=B * H * Lq * (Lk + 1),
                                      bytes_accessed=bytes_acc),
    )(q, k, v, mask_add)


# --------------------------------------------------------------------------
# Model glue (plain JAX: head split/merge + parameter bookkeeping)
# --------------------------------------------------------------------------

def _split_heads(x, num_heads):
    B, L, dm = x.shape
    return jnp.transpose(x.reshape(B, L, num_heads, dm // num_heads), (0, 2, 1, 3))


def _merge_heads(x):
    B, H, L, dk = x.shape
    return jnp.transpose(x, (0, 2, 1, 3)).reshape(B * L, H * dk)


def decoder_layer(p, x, la_add, enc_out, enc_add, num_heads):
    B, Lq, De = x.shape
    Lk = enc_out.shape[1]
    sa, ca = p["self_attn"], p["cross_attn"]
    d_model = sa["wo_w"].shape[0]
    dk = d_model // num_heads

    # ---- self-attention: fused QKV proj -> head-batched attention -> (wo + residual + LN1) ----
    residual = x
    qkv = linear(x.reshape(B * Lq, De), sa["wqkv_w"], sa["wqkv_b"], out_dtype=MXU_DTYPE)
    qkv = qkv.reshape(B, Lq, 3, num_heads, dk)
    q = jnp.transpose(qkv[:, :, 0], (0, 2, 1, 3))
    k = jnp.transpose(qkv[:, :, 1], (0, 2, 1, 3))
    v = jnp.transpose(qkv[:, :, 2], (0, 2, 1, 3))
    blended, attn_scores = attention_core(q, k, v, la_add)
    x = linear_residual_layernorm(
        _merge_heads(blended), sa["wo_w"], sa["wo_b"],
        residual.reshape(B * Lq, De), p["ln1_g"], p["ln1_b"]).reshape(B, Lq, De)

    # ---- cross-attention: Q proj + fused KV proj -> attention -> (wo + residual + LN2) ----
    residual = x
    q = _split_heads(
        linear(x.reshape(B * Lq, De), ca["wq_w"], ca["wq_b"],
               out_dtype=MXU_DTYPE).reshape(B, Lq, d_model), num_heads)
    kv = linear(enc_out.reshape(B * Lk, De), ca["wkv_w"], ca["wkv_b"],
                out_dtype=MXU_DTYPE).reshape(B, Lk, 2, num_heads, dk)
    k = jnp.transpose(kv[:, :, 0], (0, 2, 1, 3))
    v = jnp.transpose(kv[:, :, 1], (0, 2, 1, 3))
    blended, cross_scores = attention_core(q, k, v, enc_add)
    x = linear_residual_layernorm(
        _merge_heads(blended), ca["wo_w"], ca["wo_b"],
        residual.reshape(B * Lq, De), p["ln2_g"], p["ln2_b"]).reshape(B, Lq, De)

    # ---- FFN: fc1 + GELU + fc2 + residual + LN3 in one K-tiled kernel ----
    x = ffn_residual_layernorm(
        x.reshape(B * Lq, De), p["fc1_w"], p["fc1_b"], p["fc2_w"], p["fc2_b"],
        p["ln3_g"], p["ln3_b"]).reshape(B, Lq, De)

    return x, attn_scores, cross_scores


def transformer_decoder(layer_params, x, look_ahead_mask, enc_out,
                        enc_input_mask, num_heads):
    Lq = x.shape[1]
    # Additive masks (mask==0 positions get -2^63, matching the reference).
    # The look-ahead mask is kept at its natural batch size (no (B, Lq, Lq) broadcast).
    # TODO(synk): per-head (H>1) look-ahead masks are not supported (head dim must broadcast).
    lam = jnp.asarray(look_ahead_mask, jnp.float32)
    lam = lam.reshape((-1,) + lam.shape[-2:])                    # (Bm, Lq, Lq)
    la_add = (1.0 - lam) * NEG_BIG
    enc_add = ((1.0 - enc_input_mask.astype(jnp.float32)) * NEG_BIG)[:, None, :]  # (B, 1, Lk)

    attn_scores_list, cross_scores_list = [], []
    for p in layer_params:
        x, s, cs = decoder_layer(p, x, la_add, enc_out, enc_add, num_heads)
        attn_scores_list.append(s)
        cross_scores_list.append(cs)
    return x, attn_scores_list, cross_scores_list


# --------------------------------------------------------------------------
# Deterministic parameter init (matmul weights stored in MXU_DTYPE; biases / LN params f32)
# --------------------------------------------------------------------------

def _lin_params(key, din, dout):
    w = (jax.random.normal(key, (din, dout), jnp.float32) * 0.02).astype(MXU_DTYPE)
    b = jnp.zeros((dout,), jnp.float32)
    return w, b


def _self_attn_params(key, d_embed, d_model):
    kq, kk, kv, ko = jax.random.split(key, 4)
    wq, bq = _lin_params(kq, d_embed, d_model)
    wk, bk = _lin_params(kk, d_embed, d_model)
    wv, bv = _lin_params(kv, d_embed, d_model)
    wo, bo = _lin_params(ko, d_model, d_embed)
    return {"wqkv_w": jnp.concatenate([wq, wk, wv], axis=1),
            "wqkv_b": jnp.concatenate([bq, bk, bv], axis=0),
            "wo_w": wo, "wo_b": bo}


def _cross_attn_params(key, d_embed, d_model):
    kq, kk, kv, ko = jax.random.split(key, 4)
    wq, bq = _lin_params(kq, d_embed, d_model)
    wk, bk = _lin_params(kk, d_embed, d_model)
    wv, bv = _lin_params(kv, d_embed, d_model)
    wo, bo = _lin_params(ko, d_model, d_embed)
    return {"wq_w": wq, "wq_b": bq,
            "wkv_w": jnp.concatenate([wk, wv], axis=1),
            "wkv_b": jnp.concatenate([bk, bv], axis=0),
            "wo_w": wo, "wo_b": bo}


def init_params(key, num_layers, d_embed, d_model, d_intermediate):
    layers = []
    for lk in jax.random.split(key, num_layers):
        ks = jax.random.split(lk, 4)
        p = {"self_attn": _self_attn_params(ks[0], d_embed, d_model),
             "cross_attn": _cross_attn_params(ks[1], d_embed, d_model)}
        p["fc1_w"], p["fc1_b"] = _lin_params(ks[2], d_embed, d_intermediate)
        p["fc2_w"], p["fc2_b"] = _lin_params(ks[3], d_intermediate, d_embed)
        for name in ("ln1", "ln2", "ln3"):
            p[name + "_g"] = jnp.ones((d_embed,), jnp.float32)
            p[name + "_b"] = jnp.zeros((d_embed,), jnp.float32)
        layers.append(p)
    return layers


# --------------------------------------------------------------------------
# Demo
# --------------------------------------------------------------------------

if __name__ == "__main__":
    # NOTE: demo shapes are intentionally tiny; for performance measurements pad d_model /
    # d_embed / d_k to multiples of 128 and M to multiples of 8 (sub-128 lane widths are a
    # degenerate, launch-overhead-dominated path).
    B, Lq, Lk = 2, 8, 16
    num_layers, d_embed, d_model, num_heads, d_intermediate = 2, 32, 32, 4, 64

    root = jax.random.PRNGKey(0)
    k_x, k_enc, k_params = jax.random.split(root, 3)

    x = jax.random.normal(k_x, (B, Lq, d_embed), jnp.float32)
    encoder_output = jax.random.normal(k_enc, (B, Lk, d_embed), jnp.float32)

    # causal look-ahead mask (1 = attend), broadcastable to (B, H, Lq, Lq)
    look_ahead_mask = jnp.tril(jnp.ones((Lq, Lq), jnp.float32))[None, None]
    # encoder padding mask (1 = valid token); pad out last 4 positions of batch 1
    encoder_input_attention_mask = jnp.ones((B, Lk), jnp.float32).at[1, -4:].set(0.0)

    params = init_params(k_params, num_layers, d_embed, d_model, d_intermediate)

    fwd = jax.jit(functools.partial(transformer_decoder, num_heads=num_heads))
    out, attn_scores, cross_scores = fwd(
        params, x, look_ahead_mask, encoder_output, encoder_input_attention_mask)

    jax.block_until_ready(out)
    jax.block_until_ready(attn_scores)
    jax.block_until_ready(cross_scores)

    assert out.shape == (B, Lq, d_embed)
    assert len(attn_scores) == num_layers and attn_scores[0].shape == (B, num_heads, Lq, Lq)
    assert len(cross_scores) == num_layers and cross_scores[0].shape == (B, num_heads, Lq, Lk)
    assert bool(jnp.all(jnp.isfinite(out)))

    print("KERNEL_OK")
</pallas_src>

<mosaic_0001>
module attributes {stable_mosaic.version = 11 : i64} {
  func.func @_linear_kernel(%arg0: i32, %arg1: i32, %arg2: i32, %arg3: memref<16x32xf32, #tpu.memory_space<vmem>>, %arg4: memref<32x96xbf16, #tpu.memory_space<vmem>>, %arg5: memref<1x96xf32, #tpu.memory_space<vmem>>, %arg6: memref<16x96xbf16, #tpu.memory_space<vmem>>, %arg7: memref<16x96xf32, #tpu.memory_space<vmem>>) attributes {dimension_semantics = [#tpu.dimension_semantics<parallel>, #tpu.dimension_semantics<parallel>, #tpu.dimension_semantics<arbitrary>], iteration_bounds = array<i64: 1, 1, 1>, scalar_prefetch = 0 : i64, scratch_operands = 1 : i64, tpu.core_type = #tpu.core_type<tc>, window_params = [{transform_indices = @transform_0, window_bounds = array<i64: 16, 32>}, {transform_indices = @transform_1, window_bounds = array<i64: 32, 96>}, {transform_indices = @transform_2, window_bounds = array<i64: 1, 96>}, {transform_indices = @transform_3, window_bounds = array<i64: 16, 96>}]} {
    %c0_i32 = arith.constant 0 : i32
    %0 = arith.cmpi eq, %arg2, %c0_i32 : i32
    %1 = arith.extui %0 : i1 to i32
    %c0_i32_0 = arith.constant 0 : i32
    %2 = arith.cmpi ne, %1, %c0_i32_0 : i32
    scf.if %2 {
      %cst_10 = arith.constant 0.000000e+00 : f32
      %13 = vector.broadcast %cst_10 : f32 to vector<16x96xf32>
      %c0_11 = arith.constant 0 : index
      %c0_12 = arith.constant 0 : index
      %14 = vector.load %arg7[%c0_11, %c0_12] : memref<16x96xf32, #tpu.memory_space<vmem>>, vector<16x96xf32>
      tpu.vector_store %arg7[%c0_11, %c0_12], %13 {strides = array<i32>} : memref<16x96xf32, #tpu.memory_space<vmem>>, vector<16x96xf32>,
    } else {
    }
    %c0 = arith.constant 0 : index
    %c0_1 = arith.constant 0 : index
    %3 = vector.load %arg7[%c0, %c0_1] : memref<16x96xf32, #tpu.memory_space<vmem>>, vector<16x96xf32>
    %c0_2 = arith.constant 0 : index
    %c0_3 = arith.constant 0 : index
    %4 = vector.load %arg3[%c0_2, %c0_3] : memref<16x32xf32, #tpu.memory_space<vmem>>, vector<16x32xf32>
    %5 = arith.truncf %4 : vector<16x32xf32> to vector<16x32xbf16>
    %c0_4 = arith.constant 0 : index
    %c0_5 = arith.constant 0 : index
    %6 = vector.load %arg4[%c0_4, %c0_5] : memref<32x96xbf16, #tpu.memory_space<vmem>>, vector<32x96xbf16>
    %cst = arith.constant dense<0.000000e+00> : vector<16x96xf32>
    %7 = tpu.matmul %5, %6, %cst {dimension_numbers = #tpu.dot_dimension_numbers<[1], [0], [0], [1], [0, 0, 1, 1], [], []>} : vector<16x32xbf16>, vector<32x96xbf16>, vector<16x96xf32> -> vector<16x96xf32>
    %8 = arith.addf %3, %7 : vector<16x96xf32>
    %c0_6 = arith.constant 0 : index
    %c0_7 = arith.constant 0 : index
    %9 = vector.load %arg7[%c0_6, %c0_7] : memref<16x96xf32, #tpu.memory_space<vmem>>, vector<16x96xf32>
    tpu.vector_store %arg7[%c0_6, %c0_7], %8 {strides = array<i32>} : memref<16x96xf32, #tpu.memory_space<vmem>>, vector<16x96xf32>,
    %c0_i32_8 = arith.constant 0 : i32
    %10 = arith.cmpi eq, %arg2, %c0_i32_8 : i32
    %11 = arith.extui %10 : i1 to i32
    %c0_i32_9 = arith.constant 0 : i32
    %12 = arith.cmpi ne, %11, %c0_i32_9 : i32
    scf.if %12 {
      %c0_10 = arith.constant 0 : index
      %c0_11 = arith.constant 0 : index
      %13 = vector.load %arg7[%c0_10, %c0_11] : memref<16x96xf32, #tpu.memory_space<vmem>>, vector<16x96xf32>
      %c0_12 = arith.constant 0 : index
      %c0_13 = arith.constant 0 : index
      %14 = vector.load %arg5[%c0_12, %c0_13] : memref<1x96xf32, #tpu.memory_space<vmem>>, vector<1x96xf32>
      %15 = vector.broadcast %14 : vector<1x96xf32> to vector<16x96xf32>
      %16 = arith.addf %13, %15 : vector<16x96xf32>
      %17 = arith.truncf %16 : vector<16x96xf32> to vector<16x96xbf16>
      %c0_14 = arith.constant 0 : index
      %c0_15 = arith.constant 0 : index
      %18 = vector.load %arg6[%c0_14, %c0_15] : memref<16x96xbf16, #tpu.memory_space<vmem>>, vector<16x96xbf16>
      tpu.vector_store %arg6[%c0_14, %c0_15], %17 {strides = array<i32>} : memref<16x96xbf16, #tpu.memory_space<vmem>>, vector<16x96xbf16>,
    } else {
    }
    return
  }
  func.func @transform_0(%arg0: i32, %arg1: i32, %arg2: i32) -> (i32, i32) {
    %c0_i32 = arith.constant 0 : i32
    return %arg0, %arg2 : i32, i32
  }
  func.func @transform_1(%arg0: i32, %arg1: i32, %arg2: i32) -> (i32, i32) {
    %c0_i32 = arith.constant 0 : i32
    return %arg2, %arg1 : i32, i32
  }
  func.func @transform_2(%arg0: i32, %arg1: i32, %arg2: i32) -> (i32, i32) {
    %c0_i32 = arith.constant 0 : i32
    %c0_i32_0 = arith.constant 0 : i32
    return %c0_i32, %arg1 : i32, i32
  }
  func.func @transform_3(%arg0: i32, %arg1: i32, %arg2: i32) -> (i32, i32) {
    %c0_i32 = arith.constant 0 : i32
    return %arg0, %arg1 : i32, i32
  }
}

module attributes {stable_mosaic.version = 11 : i64} {
  func.func @_attn_kernel(%arg0: i32, %arg1: i32, %arg2: memref<1x4x8x8xbf16, #tpu.memory_space<vmem>>, %arg3: memref<1x4x8x8xbf16, #tpu.memory_space<vmem>>, %arg4: memref<1x4x8x8xbf16, #tpu.memory_space<vmem>>, %arg5: memref<1x8x8xf32, #tpu.memory_space<vmem>>, %arg6: memref<1x4x8x8xbf16, #tpu.memory_space<vmem>>, %arg7: memref<1x4x8x8xf32, #tpu.memory_space<vmem>>) attributes {dimension_semantics = [#tpu.dimension_semantics<parallel>, #tpu.dimension_semantics<parallel>], iteration_bounds = array<i64: 2, 1>, scalar_prefetch = 0 : i64, scratch_operands = 0 : i64, tpu.core_type = #tpu.core_type<tc>, window_params = [{transform_indices = @transform_0, window_bounds = array<i64: 1, 4, 8, 8>}, {transform_indices = @transform_1, window_bounds = array<i64: 1, 4, 8, 8>}, {transform_indices = @transform_2, window_bounds = array<i64: 1, 4, 8, 8>}, {transform_indices = @transform_3, window_bounds = array<i64: 1, 8, 8>}, {transform_indices = @transform_4, window_bounds = array<i64: 1, 4, 8, 8>}, {transform_indices = @transform_5, window_bounds = array<i64: 1, 4, 8, 8>}]} {
    %c0 = arith.constant 0 : index
    %c0_0 = arith.constant 0 : index
    %c0_1 = arith.constant 0 : index
    %c0_2 = arith.constant 0 : index
    %0 = vector.load %arg2[%c0, %c0_0, %c0_1, %c0_2] : memref<1x4x8x8xbf16, #tpu.memory_space<vmem>>, vector<1x4x8x8xbf16>
    %1 = vector.shape_cast %0 : vector<1x4x8x8xbf16> to vector<4x8x8xbf16>
    %c0_3 = arith.constant 0 : index
    %c0_4 = arith.constant 0 : index
    %c0_5 = arith.constant 0 : index
    %c0_6 = arith.constant 0 : index
    %2 = vector.load %arg3[%c0_3, %c0_4, %c0_5, %c0_6] : memref<1x4x8x8xbf16, #tpu.memory_space<vmem>>, vector<1x4x8x8xbf16>
    %3 = vector.shape_cast %2 : vector<1x4x8x8xbf16> to vector<4x8x8xbf16>
    %c0_7 = arith.constant 0 : index
    %c0_8 = arith.constant 0 : index
    %c0_9 = arith.constant 0 : index
    %c0_10 = arith.constant 0 : index
    %4 = vector.load %arg4[%c0_7, %c0_8, %c0_9, %c0_10] : memref<1x4x8x8xbf16, #tpu.memory_space<vmem>>, vector<1x4x8x8xbf16>
    %5 = vector.shape_cast %4 : vector<1x4x8x8xbf16> to vector<4x8x8xbf16>
    "tpu.trace_start"() <{level = 10 : i32, message = "hqd,hkd->hqk"}> : () -> ()
    %cst = arith.constant dense<0.000000e+00> : vector<4x8x8xf32>
    %6 = tpu.matmul %1, %3, %cst {dimension_numbers = #tpu.dot_dimension_numbers<[2], [2], [1], [1], [0, 0, 0, 1, 1, 1], [0], [0]>} : vector<4x8x8xbf16>, vector<4x8x8xbf16>, vector<4x8x8xf32> -> vector<4x8x8xf32>
    "tpu.trace_stop"() : () -> ()
    %c0_11 = arith.constant 0 : index
    %c0_12 = arith.constant 0 : index
    %c0_13 = arith.constant 0 : index
    %7 = vector.load %arg5[%c0_11, %c0_12, %c0_13] : memref<1x8x8xf32, #tpu.memory_space<vmem>>, vector<1x8x8xf32>
    %8 = vector.shape_cast %7 : vector<1x8x8xf32> to vector<8x8xf32>
    %9 = vector.shape_cast %8 : vector<8x8xf32> to vector<1x8x8xf32>
    %10 = vector.broadcast %9 : vector<1x8x8xf32> to vector<4x8x8xf32>
    %11 = arith.addf %6, %10 : vector<4x8x8xf32>
    %cst_14 = arith.constant 0.353553385 : f32
    %12 = vector.broadcast %cst_14 : f32 to vector<4x8x8xf32>
    %13 = arith.mulf %11, %12 : vector<4x8x8xf32>
    %cst_15 = arith.constant dense<0xFF800000> : vector<4x8xf32>
    %14 = vector.multi_reduction <maximumf>, %13, %cst_15 [2] : vector<4x8x8xf32> to vector<4x8xf32>
    %15 = vector.shape_cast %14 : vector<4x8xf32> to vector<4x8x1xf32>
    %16 = vector.broadcast %15 : vector<4x8x1xf32> to vector<4x8x8xf32>
    %17 = arith.subf %13, %16 : vector<4x8x8xf32>
    %18 = math.exp %17 : vector<4x8x8xf32>
    %cst_16 = arith.constant dense<0.000000e+00> : vector<4x8xf32>
    %19 = vector.multi_reduction <add>, %18, %cst_16 [2] : vector<4x8x8xf32> to vector<4x8xf32>
    %20 = vector.shape_cast %19 : vector<4x8xf32> to vector<4x8x1xf32>
    %21 = tpu.reciprocal %20 {approx = true} : vector<4x8x1xf32> -> vector<4x8x1xf32>
    %22 = vector.broadcast %21 : vector<4x8x1xf32> to vector<4x8x8xf32>
    %23 = arith.mulf %18, %22 : vector<4x8x8xf32>
    %c0_17 = arith.constant 0 : index
    %c0_18 = arith.constant 0 : index
    %c0_19 = arith.constant 0 : index
    %c0_20 = arith.constant 0 : index
    %24 = vector.load %arg7[%c0_17, %c0_18, %c0_19, %c0_20] : memref<1x4x8x8xf32, #tpu.memory_space<vmem>>, vector<1x4x8x8xf32>
    %25 = vector.shape_cast %24 : vector<1x4x8x8xf32> to vector<4x8x8xf32>
    %26 = vector.shape_cast %23 : vector<4x8x8xf32> to vector<1x4x8x8xf32>
    tpu.vector_store %arg7[%c0_17, %c0_18, %c0_19, %c0_20], %26 {strides = array<i32>} : memref<1x4x8x8xf32, #tpu.memory_space<vmem>>, vector<1x4x8x8xf32>,
    %27 = arith.truncf %23 : vector<4x8x8xf32> to vector<4x8x8xbf16>
    "tpu.trace_start"() <{level = 10 : i32, message = "hqk,hkd->hqd"}> : () -> ()
    %cst_21 = arith.constant dense<0.000000e+00> : vector<4x8x8xf32>
    %28 = tpu.matmul %27, %5, %cst_21 {dimension_numbers = #tpu.dot_dimension_numbers<[2], [1], [1], [2], [0, 0, 0, 1, 1, 2], [0], [0]>} : vector<4x8x8xbf16>, vector<4x8x8xbf16>, vector<4x8x8xf32> -> vector<4x8x8xf32>
    "tpu.trace_stop"() : () -> ()
    %29 = arith.truncf %28 : vector<4x8x8xf32> to vector<4x8x8xbf16>
    %c0_22 = arith.constant 0 : index
    %c0_23 = arith.constant 0 : index
    %c0_24 = arith.constant 0 : index
    %c0_25 = arith.constant 0 : index
    %30 = vector.load %arg6[%c0_22, %c0_23, %c0_24, %c0_25] : memref<1x4x8x8xbf16, #tpu.memory_space<vmem>>, vector<1x4x8x8xbf16>
    %31 = vector.shape_cast %30 : vector<1x4x8x8xbf16> to vector<4x8x8xbf16>
    %32 = vector.shape_cast %29 : vector<4x8x8xbf16> to vector<1x4x8x8xbf16>
    tpu.vector_store %arg6[%c0_22, %c0_23, %c0_24, %c0_25], %32 {strides = array<i32>} : memref<1x4x8x8xbf16, #tpu.memory_space<vmem>>, vector<1x4x8x8xbf16>,
    return
  }
  func.func @transform_0(%arg0: i32, %arg1: i32) -> (i32, i32, i32, i32) {
    %c0_i32 = arith.constant 0 : i32
    %c0_i32_0 = arith.constant 0 : i32
    %c0_i32_1 = arith.constant 0 : i32
    return %arg0, %c0_i32, %arg1, %c0_i32_0 : i32, i32, i32, i32
  }
  func.func @transform_1(%arg0: i32, %arg1: i32) -> (i32, i32, i32, i32) {
    %c0_i32 = arith.constant 0 : i32
    %c0_i32_0 = arith.constant 0 : i32
    %c0_i32_1 = arith.constant 0 : i32
    %c0_i32_2 = arith.constant 0 : i32
    return %arg0, %c0_i32, %c0_i32_0, %c0_i32_1 : i32, i32, i32, i32
  }
  func.func @transform_2(%arg0: i32, %arg1: i32) -> (i32, i32, i32, i32) {
    %c0_i32 = arith.constant 0 : i32
    %c0_i32_0 = arith.constant 0 : i32
    %c0_i32_1 = arith.constant 0 : i32
    %c0_i32_2 = arith.constant 0 : i32
    return %arg0, %c0_i32, %c0_i32_0, %c0_i32_1 : i32, i32, i32, i32
  }
  func.func @transform_3(%arg0: i32, %arg1: i32) -> (i32, i32, i32) {
    %c0_i32 = arith.constant 0 : i32
    %c0_i32_0 = arith.constant 0 : i32
    %c0_i32_1 = arith.constant 0 : i32
    return %c0_i32, %arg1, %c0_i32_0 : i32, i32, i32
  }
  func.func @transform_4(%arg0: i32, %arg1: i32) -> (i32, i32, i32, i32) {
    %c0_i32 = arith.constant 0 : i32
    %c0_i32_0 = arith.constant 0 : i32
    %c0_i32_1 = arith.constant 0 : i32
    return %arg0, %c0_i32, %arg1, %c0_i32_0 : i32, i32, i32, i32
  }
  func.func @transform_5(%arg0: i32, %arg1: i32) -> (i32, i32, i32, i32) {
    %c0_i32 = arith.constant 0 : i32
    %c0_i32_0 = arith.constant 0 : i32
    %c0_i32_1 = arith.constant 0 : i32
    return %arg0, %c0_i32, %arg1, %c0_i32_0 : i32, i32, i32, i32
  }
}

module attributes {stable_mosaic.version = 11 : i64} {
  func.func @_linear_res_ln_kernel(%arg0: i32, %arg1: i32, %arg2: memref<16x32xbf16, #tpu.memory_space<vmem>>, %arg3: memref<32x32xbf16, #tpu.memory_space<vmem>>, %arg4: memref<1x32xf32, #tpu.memory_space<vmem>>, %arg5: memref<16x32xf32, #tpu.memory_space<vmem>>, %arg6: memref<1x32xf32, #tpu.memory_space<vmem>>, %arg7: memref<1x32xf32, #tpu.memory_space<vmem>>, %arg8: memref<16x32xf32, #tpu.memory_space<vmem>>, %arg9: memref<16x32xf32, #tpu.memory_space<vmem>>) attributes {dimension_semantics = [#tpu.dimension_semantics<parallel>, #tpu.dimension_semantics<arbitrary>], iteration_bounds = array<i64: 1, 1>, scalar_prefetch = 0 : i64, scratch_operands = 1 : i64, tpu.core_type = #tpu.core_type<tc>, window_params = [{transform_indices = @transform_0, window_bounds = array<i64: 16, 32>}, {transform_indices = @transform_1, window_bounds = array<i64: 32, 32>}, {pipeline_mode = #tpu.pipeline_mode<synchronous>, transform_indices = @transform_2, window_bounds = array<i64: 1, 32>}, {transform_indices = @transform_3, window_bounds = array<i64: 16, 32>}, {pipeline_mode = #tpu.pipeline_mode<synchronous>, transform_indices = @transform_4, window_bounds = array<i64: 1, 32>}, {pipeline_mode = #tpu.pipeline_mode<synchronous>, transform_indices = @transform_5, window_bounds = array<i64: 1, 32>}, {transform_indices = @transform_6, window_bounds = array<i64: 16, 32>}]} {
    %c0_i32 = arith.constant 0 : i32
    %0 = arith.cmpi eq, %arg1, %c0_i32 : i32
    %1 = arith.extui %0 : i1 to i32
    %c0_i32_0 = arith.constant 0 : i32
    %2 = arith.cmpi ne, %1, %c0_i32_0 : i32
    scf.if %2 {
      %cst_10 = arith.constant 0.000000e+00 : f32
      %12 = vector.broadcast %cst_10 : f32 to vector<16x32xf32>
      %c0_11 = arith.constant 0 : index
      %c0_12 = arith.constant 0 : index
      %13 = vector.load %arg9[%c0_11, %c0_12] : memref<16x32xf32, #tpu.memory_space<vmem>>, vector<16x32xf32>
      tpu.vector_store %arg9[%c0_11, %c0_12], %12 {strides = array<i32>} : memref<16x32xf32, #tpu.memory_space<vmem>>, vector<16x32xf32>,
    } else {
    }
    %c0 = arith.constant 0 : index
    %c0_1 = arith.constant 0 : index
    %3 = vector.load %arg9[%c0, %c0_1] : memref<16x32xf32, #tpu.memory_space<vmem>>, vector<16x32xf32>
    %c0_2 = arith.constant 0 : index
    %c0_3 = arith.constant 0 : index
    %4 = vector.load %arg2[%c0_2, %c0_3] : memref<16x32xbf16, #tpu.memory_space<vmem>>, vector<16x32xbf16>
    %c0_4 = arith.constant 0 : index
    %c0_5 = arith.constant 0 : index
    %5 = vector.load %arg3[%c0_4, %c0_5] : memref<32x32xbf16, #tpu.memory_space<vmem>>, vector<32x32xbf16>
    %cst = arith.constant dense<0.000000e+00> : vector<16x32xf32>
    %6 = tpu.matmul %4, %5, %cst {dimension_numbers = #tpu.dot_dimension_numbers<[1], [0], [0], [1], [0, 0, 1, 1], [], []>} : vector<16x32xbf16>, vector<32x32xbf16>, vector<16x32xf32> -> vector<16x32xf32>
    %7 = arith.addf %3, %6 : vector<16x32xf32>
    %c0_6 = arith.constant 0 : index
    %c0_7 = arith.constant 0 : index
    %8 = vector.load %arg9[%c0_6, %c0_7] : memref<16x32xf32, #tpu.memory_space<vmem>>, vector<16x32xf32>
    tpu.vector_store %arg9[%c0_6, %c0_7], %7 {strides = array<i32>} : memref<16x32xf32, #tpu.memory_space<vmem>>, vector<16x32xf32>,
    %c0_i32_8 = arith.constant 0 : i32
    %9 = arith.cmpi eq, %arg1, %c0_i32_8 : i32
    %10 = arith.extui %9 : i1 to i32
    %c0_i32_9 = arith.constant 0 : i32
    %11 = arith.cmpi ne, %10, %c0_i32_9 : i32
    scf.if %11 {
      %c0_10 = arith.constant 0 : index
      %c0_11 = arith.constant 0 : index
      %12 = vector.load %arg9[%c0_10, %c0_11] : memref<16x32xf32, #tpu.memory_space<vmem>>, vector<16x32xf32>
      %c0_12 = arith.constant 0 : index
      %c0_13 = arith.constant 0 : index
      %13 = vector.load %arg4[%c0_12, %c0_13] : memref<1x32xf32, #tpu.memory_space<vmem>>, vector<1x32xf32>
      %14 = vector.broadcast %13 : vector<1x32xf32> to vector<16x32xf32>
      %15 = arith.addf %12, %14 : vector<16x32xf32>
      %c0_14 = arith.constant 0 : index
      %c0_15 = arith.constant 0 : index
      %16 = vector.load %arg5[%c0_14, %c0_15] : memref<16x32xf32, #tpu.memory_space<vmem>>, vector<16x32xf32>
      %17 = arith.addf %15, %16 : vector<16x32xf32>
      %cst_16 = arith.constant dense<0.000000e+00> : vector<16xf32>
      %18 = vector.multi_reduction <add>, %17, %cst_16 [1] : vector<16x32xf32> to vector<16xf32>
      %19 = vector.shape_cast %18 : vector<16xf32> to vector<16x1xf32>
      %cst_17 = arith.constant 3.200000e+01 : f32
      %20 = vector.broadcast %cst_17 : f32 to vector<16x1xf32>
      %21 = arith.divf %19, %20 : vector<16x1xf32>
      %22 = vector.broadcast %21 : vector<16x1xf32> to vector<16x32xf32>
      %23 = arith.subf %17, %22 : vector<16x32xf32>
      %24 = arith.mulf %23, %23 : vector<16x32xf32>
      %cst_18 = arith.constant dense<0.000000e+00> : vector<16xf32>
      %25 = vector.multi_reduction <add>, %24, %cst_18 [1] : vector<16x32xf32> to vector<16xf32>
      %26 = vector.shape_cast %25 : vector<16xf32> to vector<16x1xf32>
      %cst_19 = arith.constant 3.200000e+01 : f32
      %27 = vector.broadcast %cst_19 : f32 to vector<16x1xf32>
      %28 = arith.divf %26, %27 : vector<16x1xf32>
      %29 = vector.broadcast %21 : vector<16x1xf32> to vector<16x32xf32>
      %30 = arith.subf %17, %29 : vector<16x32xf32>
      %cst_20 = arith.constant 9.99999974E-6 : f32
      %31 = vector.broadcast %cst_20 : f32 to vector<16x1xf32>
      %32 = arith.addf %28, %31 : vector<16x1xf32>
      %33 = math.rsqrt %32 : vector<16x1xf32>
      %34 = vector.broadcast %33 : vector<16x1xf32> to vector<16x32xf32>
      %35 = arith.mulf %30, %34 : vector<16x32xf32>
      %c0_21 = arith.constant 0 : index
      %c0_22 = arith.constant 0 : index
      %36 = vector.load %arg6[%c0_21, %c0_22] : memref<1x32xf32, #tpu.memory_space<vmem>>, vector<1x32xf32>
      %37 = vector.broadcast %36 : vector<1x32xf32> to vector<16x32xf32>
      %38 = arith.mulf %35, %37 : vector<16x32xf32>
      %c0_23 = arith.constant 0 : index
      %c0_24 = arith.constant 0 : index
      %39 = vector.load %arg7[%c0_23, %c0_24] : memref<1x32xf32, #tpu.memory_space<vmem>>, vector<1x32xf32>
      %40 = vector.broadcast %39 : vector<1x32xf32> to vector<16x32xf32>
      %41 = arith.addf %38, %40 : vector<16x32xf32>
      %c0_25 = arith.constant 0 : index
      %c0_26 = arith.constant 0 : index
      %42 = vector.load %arg8[%c0_25, %c0_26] : memref<16x32xf32, #tpu.memory_space<vmem>>, vector<16x32xf32>
      tpu.vector_store %arg8[%c0_25, %c0_26], %41 {strides = array<i32>} : memref<16x32xf32, #tpu.memory_space<vmem>>, vector<16x32xf32>,
    } else {
    }
    return
  }
  func.func @transform_0(%arg0: i32, %arg1: i32) -> (i32, i32) {
    %c0_i32 = arith.constant 0 : i32
    return %arg0, %arg1 : i32, i32
  }
  func.func @transform_1(%arg0: i32, %arg1: i32) -> (i32, i32) {
    %c0_i32 = arith.constant 0 : i32
    %c0_i32_0 = arith.constant 0 : i32
    return %arg1, %c0_i32 : i32, i32
  }
  func.func @transform_2(%arg0: i32, %arg1: i32) -> (i32, i32) {
    %c0_i32 = arith.constant 0 : i32
    %c0_i32_0 = arith.constant 0 : i32
    %c0_i32_1 = arith.constant 0 : i32
    return %c0_i32, %c0_i32_0 : i32, i32
  }
  func.func @transform_3(%arg0: i32, %arg1: i32) -> (i32, i32) {
    %c0_i32 = arith.constant 0 : i32
    %c0_i32_0 = arith.constant 0 : i32
    return %arg0, %c0_i32 : i32, i32
  }
  func.func @transform_4(%arg0: i32, %arg1: i32) -> (i32, i32) {
    %c0_i32 = arith.constant 0 : i32
    %c0_i32_0 = arith.constant 0 : i32
    %c0_i32_1 = arith.constant 0 : i32
    return %c0_i32, %c0_i32_0 : i32, i32
  }
  func.func @transform_5(%arg0: i32, %arg1: i32) -> (i32, i32) {
    %c0_i32 = arith.constant 0 : i32
    %c0_i32_0 = arith.constant 0 : i32
    %c0_i32_1 = arith.constant 0 : i32
    return %c0_i32, %c0_i32_0 : i32, i32
  }
  func.func @transform_6(%arg0: i32, %arg1: i32) -> (i32, i32) {
    %c0_i32 = arith.constant 0 : i32
    %c0_i32_0 = arith.constant 0 : i32
    return %arg0, %c0_i32 : i32, i32
  }
}

module attributes {stable_mosaic.version = 11 : i64} {
  func.func @_linear_kernel(%arg0: i32, %arg1: i32, %arg2: i32, %arg3: memref<16x32xf32, #tpu.memory_space<vmem>>, %arg4: memref<32x32xbf16, #tpu.memory_space<vmem>>, %arg5: memref<1x32xf32, #tpu.memory_space<vmem>>, %arg6: memref<16x32xbf16, #tpu.memory_space<vmem>>, %arg7: memref<16x32xf32, #tpu.memory_space<vmem>>) attributes {dimension_semantics = [#tpu.dimension_semantics<parallel>, #tpu.dimension_semantics<parallel>, #tpu.dimension_semantics<arbitrary>], iteration_bounds = array<i64: 1, 1, 1>, scalar_prefetch = 0 : i64, scratch_operands = 1 : i64, tpu.core_type = #tpu.core_type<tc>, window_params = [{transform_indices = @transform_0, window_bounds = array<i64: 16, 32>}, {transform_indices = @transform_1, window_bounds = array<i64: 32, 32>}, {transform_indices = @transform_2, window_bounds = array<i64: 1, 32>}, {transform_indices = @transform_3, window_bounds = array<i64: 16, 32>}]} {
    %c0_i32 = arith.constant 0 : i32
    %0 = arith.cmpi eq, %arg2, %c0_i32 : i32
    %1 = arith.extui %0 : i1 to i32
    %c0_i32_0 = arith.constant 0 : i32
    %2 = arith.cmpi ne, %1, %c0_i32_0 : i32
    scf.if %2 {
      %cst_10 = arith.constant 0.000000e+00 : f32
      %13 = vector.broadcast %cst_10 : f32 to vector<16x32xf32>
      %c0_11 = arith.constant 0 : index
      %c0_12 = arith.constant 0 : index
      %14 = vector.load %arg7[%c0_11, %c0_12] : memref<16x32xf32, #tpu.memory_space<vmem>>, vector<16x32xf32>
      tpu.vector_store %arg7[%c0_11, %c0_12], %13 {strides = array<i32>} : memref<16x32xf32, #tpu.memory_space<vmem>>, vector<16x32xf32>,
    } else {
    }
    %c0 = arith.constant 0 : index
    %c0_1 = arith.constant 0 : index
    %3 = vector.load %arg7[%c0, %c0_1] : memref<16x32xf32, #tpu.memory_space<vmem>>, vector<16x32xf32>
    %c0_2 = arith.constant 0 : index
    %c0_3 = arith.constant 0 : index
    %4 = vector.load %arg3[%c0_2, %c0_3] : memref<16x32xf32, #tpu.memory_space<vmem>>, vector<16x32xf32>
    %5 = arith.truncf %4 : vector<16x32xf32> to vector<16x32xbf16>
    %c0_4 = arith.constant 0 : index
    %c0_5 = arith.constant 0 : index
    %6 = vector.load %arg4[%c0_4, %c0_5] : memref<32x32xbf16, #tpu.memory_space<vmem>>, vector<32x32xbf16>
    %cst = arith.constant dense<0.000000e+00> : vector<16x32xf32>
    %7 = tpu.matmul %5, %6, %cst {dimension_numbers = #tpu.dot_dimension_numbers<[1], [0], [0], [1], [0, 0, 1, 1], [], []>} : vector<16x32xbf16>, vector<32x32xbf16>, vector<16x32xf32> -> vector<16x32xf32>
    %8 = arith.addf %3, %7 : vector<16x32xf32>
    %c0_6 = arith.constant 0 : index
    %c0_7 = arith.constant 0 : index
    %9 = vector.load %arg7[%c0_6, %c0_7] : memref<16x32xf32, #tpu.memory_space<vmem>>, vector<16x32xf32>
    tpu.vector_store %arg7[%c0_6, %c0_7], %8 {strides = array<i32>} : memref<16x32xf32, #tpu.memory_space<vmem>>, vector<16x32xf32>,
    %c0_i32_8 = arith.constant 0 : i32
    %10 = arith.cmpi eq, %arg2, %c0_i32_8 : i32
    %11 = arith.extui %10 : i1 to i32
    %c0_i32_9 = arith.constant 0 : i32
    %12 = arith.cmpi ne, %11, %c0_i32_9 : i32
    scf.if %12 {
      %c0_10 = arith.constant 0 : index
      %c0_11 = arith.constant 0 : index
      %13 = vector.load %arg7[%c0_10, %c0_11] : memref<16x32xf32, #tpu.memory_space<vmem>>, vector<16x32xf32>
      %c0_12 = arith.constant 0 : index
      %c0_13 = arith.constant 0 : index
      %14 = vector.load %arg5[%c0_12, %c0_13] : memref<1x32xf32, #tpu.memory_space<vmem>>, vector<1x32xf32>
      %15 = vector.broadcast %14 : vector<1x32xf32> to vector<16x32xf32>
      %16 = arith.addf %13, %15 : vector<16x32xf32>
      %17 = arith.truncf %16 : vector<16x32xf32> to vector<16x32xbf16>
      %c0_14 = arith.constant 0 : index
      %c0_15 = arith.constant 0 : index
      %18 = vector.load %arg6[%c0_14, %c0_15] : memref<16x32xbf16, #tpu.memory_space<vmem>>, vector<16x32xbf16>
      tpu.vector_store %arg6[%c0_14, %c0_15], %17 {strides = array<i32>} : memref<16x32xbf16, #tpu.memory_space<vmem>>, vector<16x32xbf16>,
    } else {
    }
    return
  }
  func.func @transform_0(%arg0: i32, %arg1: i32, %arg2: i32) -> (i32, i32) {
    %c0_i32 = arith.constant 0 : i32
    return %arg0, %arg2 : i32, i32
  }
  func.func @transform_1(%arg0: i32, %arg1: i32, %arg2: i32) -> (i32, i32) {
    %c0_i32 = arith.constant 0 : i32
    return %arg2, %arg1 : i32, i32
  }
  func.func @transform_2(%arg0: i32, %arg1: i32, %arg2: i32) -> (i32, i32) {
    %c0_i32 = arith.constant 0 : i32
    %c0_i32_0 = arith.constant 0 : i32
    return %c0_i32, %arg1 : i32, i32
  }
  func.func @transform_3(%arg0: i32, %arg1: i32, %arg2: i32) -> (i32, i32) {
    %c0_i32 = arith.constant 0 : i32
    return %arg0, %arg1 : i32, i32
  }
}

module attributes {stable_mosaic.version = 11 : i64} {
  func.func @_linear_kernel(%arg0: i32, %arg1: i32, %arg2: i32, %arg3: memref<32x32xf32, #tpu.memory_space<vmem>>, %arg4: memref<32x64xbf16, #tpu.memory_space<vmem>>, %arg5: memref<1x64xf32, #tpu.memory_space<vmem>>, %arg6: memref<32x64xbf16, #tpu.memory_space<vmem>>, %arg7: memref<32x64xf32, #tpu.memory_space<vmem>>) attributes {dimension_semantics = [#tpu.dimension_semantics<parallel>, #tpu.dimension_semantics<parallel>, #tpu.dimension_semantics<arbitrary>], iteration_bounds = array<i64: 1, 1, 1>, scalar_prefetch = 0 : i64, scratch_operands = 1 : i64, tpu.core_type = #tpu.core_type<tc>, window_params = [{transform_indices = @transform_0, window_bounds = array<i64: 32, 32>}, {transform_indices = @transform_1, window_bounds = array<i64: 32, 64>}, {transform_indices = @transform_2, window_bounds = array<i64: 1, 64>}, {transform_indices = @transform_3, window_bounds = array<i64: 32, 64>}]} {
    %c0_i32 = arith.constant 0 : i32
    %0 = arith.cmpi eq, %arg2, %c0_i32 : i32
    %1 = arith.extui %0 : i1 to i32
    %c0_i32_0 = arith.constant 0 : i32
    %2 = arith.cmpi ne, %1, %c0_i32_0 : i32
    scf.if %2 {
      %cst_10 = arith.constant 0.000000e+00 : f32
      %13 = vector.broadcast %cst_10 : f32 to vector<32x64xf32>
      %c0_11 = arith.constant 0 : index
      %c0_12 = arith.constant 0 : index
      %14 = vector.load %arg7[%c0_11, %c0_12] : memref<32x64xf32, #tpu.memory_space<vmem>>, vector<32x64xf32>
      tpu.vector_store %arg7[%c0_11, %c0_12], %13 {strides = array<i32>} : memref<32x64xf32, #tpu.memory_space<vmem>>, vector<32x64xf32>,
    } else {
    }
    %c0 = arith.constant 0 : index
    %c0_1 = arith.constant 0 : index
    %3 = vector.load %arg7[%c0, %c0_1] : memref<32x64xf32, #tpu.memory_space<vmem>>, vector<32x64xf32>
    %c0_2 = arith.constant 0 : index
    %c0_3 = arith.constant 0 : index
    %4 = vector.load %arg3[%c0_2, %c0_3] : memref<32x32xf32, #tpu.memory_space<vmem>>, vector<32x32xf32>
    %5 = arith.truncf %4 : vector<32x32xf32> to vector<32x32xbf16>
    %c0_4 = arith.constant 0 : index
    %c0_5 = arith.constant 0 : index
    %6 = vector.load %arg4[%c0_4, %c0_5] : memref<32x64xbf16, #tpu.memory_space<vmem>>, vector<32x64xbf16>
    %cst = arith.constant dense<0.000000e+00> : vector<32x64xf32>
    %7 = tpu.matmul %5, %6, %cst {dimension_numbers = #tpu.dot_dimension_numbers<[1], [0], [0], [1], [0, 0, 1, 1], [], []>} : vector<32x32xbf16>, vector<32x64xbf16>, vector<32x64xf32> -> vector<32x64xf32>
    %8 = arith.addf %3, %7 : vector<32x64xf32>
    %c0_6 = arith.constant 0 : index
    %c0_7 = arith.constant 0 : index
    %9 = vector.load %arg7[%c0_6, %c0_7] : memref<32x64xf32, #tpu.memory_space<vmem>>, vector<32x64xf32>
    tpu.vector_store %arg7[%c0_6, %c0_7], %8 {strides = array<i32>} : memref<32x64xf32, #tpu.memory_space<vmem>>, vector<32x64xf32>,
    %c0_i32_8 = arith.constant 0 : i32
    %10 = arith.cmpi eq, %arg2, %c0_i32_8 : i32
    %11 = arith.extui %10 : i1 to i32
    %c0_i32_9 = arith.constant 0 : i32
    %12 = arith.cmpi ne, %11, %c0_i32_9 : i32
    scf.if %12 {
      %c0_10 = arith.constant 0 : index
      %c0_11 = arith.constant 0 : index
      %13 = vector.load %arg7[%c0_10, %c0_11] : memref<32x64xf32, #tpu.memory_space<vmem>>, vector<32x64xf32>
      %c0_12 = arith.constant 0 : index
      %c0_13 = arith.constant 0 : index
      %14 = vector.load %arg5[%c0_12, %c0_13] : memref<1x64xf32, #tpu.memory_space<vmem>>, vector<1x64xf32>
      %15 = vector.broadcast %14 : vector<1x64xf32> to vector<32x64xf32>
      %16 = arith.addf %13, %15 : vector<32x64xf32>
      %17 = arith.truncf %16 : vector<32x64xf32> to vector<32x64xbf16>
      %c0_14 = arith.constant 0 : index
      %c0_15 = arith.constant 0 : index
      %18 = vector.load %arg6[%c0_14, %c0_15] : memref<32x64xbf16, #tpu.memory_space<vmem>>, vector<32x64xbf16>
      tpu.vector_store %arg6[%c0_14, %c0_15], %17 {strides = array<i32>} : memref<32x64xbf16, #tpu.memory_space<vmem>>, vector<32x64xbf16>,
    } else {
    }
    return
  }
  func.func @transform_0(%arg0: i32, %arg1: i32, %arg2: i32) -> (i32, i32) {
    %c0_i32 = arith.constant 0 : i32
    return %arg0, %arg2 : i32, i32
  }
  func.func @transform_1(%arg0: i32, %arg1: i32, %arg2: i32) -> (i32, i32) {
    %c0_i32 = arith.constant 0 : i32
    return %arg2, %arg1 : i32, i32
  }
  func.func @transform_2(%arg0: i32, %arg1: i32, %arg2: i32) -> (i32, i32) {
    %c0_i32 = arith.constant 0 : i32
    %c0_i32_0 = arith.constant 0 : i32
    return %c0_i32, %arg1 : i32, i32
  }
  func.func @transform_3(%arg0: i32, %arg1: i32, %arg2: i32) -> (i32, i32) {
    %c0_i32 = arith.constant 0 : i32
    return %arg0, %arg1 : i32, i32
  }
}

module attributes {stable_mosaic.version = 11 : i64} {
  func.func @_attn_kernel(%arg0: i32, %arg1: i32, %arg2: memref<1x4x8x8xbf16, #tpu.memory_space<vmem>>, %arg3: memref<1x4x16x8xbf16, #tpu.memory_space<vmem>>, %arg4: memref<1x4x16x8xbf16, #tpu.memory_space<vmem>>, %arg5: memref<1x1x16xf32, #tpu.memory_space<vmem>>, %arg6: memref<1x4x8x8xbf16, #tpu.memory_space<vmem>>, %arg7: memref<1x4x8x16xf32, #tpu.memory_space<vmem>>) attributes {dimension_semantics = [#tpu.dimension_semantics<parallel>, #tpu.dimension_semantics<parallel>], iteration_bounds = array<i64: 2, 1>, scalar_prefetch = 0 : i64, scratch_operands = 0 : i64, tpu.core_type = #tpu.core_type<tc>, window_params = [{transform_indices = @transform_0, window_bounds = array<i64: 1, 4, 8, 8>}, {transform_indices = @transform_1, window_bounds = array<i64: 1, 4, 16, 8>}, {transform_indices = @transform_2, window_bounds = array<i64: 1, 4, 16, 8>}, {transform_indices = @transform_3, window_bounds = array<i64: 1, 1, 16>}, {transform_indices = @transform_4, window_bounds = array<i64: 1, 4, 8, 8>}, {transform_indices = @transform_5, window_bounds = array<i64: 1, 4, 8, 16>}]} {
    %c0 = arith.constant 0 : index
    %c0_0 = arith.constant 0 : index
    %c0_1 = arith.constant 0 : index
    %c0_2 = arith.constant 0 : index
    %0 = vector.load %arg2[%c0, %c0_0, %c0_1, %c0_2] : memref<1x4x8x8xbf16, #tpu.memory_space<vmem>>, vector<1x4x8x8xbf16>
    %1 = vector.shape_cast %0 : vector<1x4x8x8xbf16> to vector<4x8x8xbf16>
    %c0_3 = arith.constant 0 : index
    %c0_4 = arith.constant 0 : index
    %c0_5 = arith.constant 0 : index
    %c0_6 = arith.constant 0 : index
    %2 = vector.load %arg3[%c0_3, %c0_4, %c0_5, %c0_6] : memref<1x4x16x8xbf16, #tpu.memory_space<vmem>>, vector<1x4x16x8xbf16>
    %3 = vector.shape_cast %2 : vector<1x4x16x8xbf16> to vector<4x16x8xbf16>
    %c0_7 = arith.constant 0 : index
    %c0_8 = arith.constant 0 : index
    %c0_9 = arith.constant 0 : index
    %c0_10 = arith.constant 0 : index
    %4 = vector.load %arg4[%c0_7, %c0_8, %c0_9, %c0_10] : memref<1x4x16x8xbf16, #tpu.memory_space<vmem>>, vector<1x4x16x8xbf16>
    %5 = vector.shape_cast %4 : vector<1x4x16x8xbf16> to vector<4x16x8xbf16>
    "tpu.trace_start"() <{level = 10 : i32, message = "hqd,hkd->hqk"}> : () -> ()
    %cst = arith.constant dense<0.000000e+00> : vector<4x8x16xf32>
    %6 = tpu.matmul %1, %3, %cst {dimension_numbers = #tpu.dot_dimension_numbers<[2], [2], [1], [1], [0, 0, 0, 1, 1, 1], [0], [0]>} : vector<4x8x8xbf16>, vector<4x16x8xbf16>, vector<4x8x16xf32> -> vector<4x8x16xf32>
    "tpu.trace_stop"() : () -> ()
    %c0_11 = arith.constant 0 : index
    %c0_12 = arith.constant 0 : index
    %c0_13 = arith.constant 0 : index
    %7 = vector.load %arg5[%c0_11, %c0_12, %c0_13] : memref<1x1x16xf32, #tpu.memory_space<vmem>>, vector<1x1x16xf32>
    %8 = vector.shape_cast %7 : vector<1x1x16xf32> to vector<1x16xf32>
    %9 = vector.shape_cast %8 : vector<1x16xf32> to vector<1x1x16xf32>
    %10 = vector.broadcast %9 : vector<1x1x16xf32> to vector<4x8x16xf32>
    %11 = arith.addf %6, %10 : vector<4x8x16xf32>
    %cst_14 = arith.constant 2.500000e-01 : f32
    %12 = vector.broadcast %cst_14 : f32 to vector<4x8x16xf32>
    %13 = arith.mulf %11, %12 : vector<4x8x16xf32>
    %cst_15 = arith.constant dense<0xFF800000> : vector<4x8xf32>
    %14 = vector.multi_reduction <maximumf>, %13, %cst_15 [2] : vector<4x8x16xf32> to vector<4x8xf32>
    %15 = vector.shape_cast %14 : vector<4x8xf32> to vector<4x8x1xf32>
    %16 = vector.broadcast %15 : vector<4x8x1xf32> to vector<4x8x16xf32>
    %17 = arith.subf %13, %16 : vector<4x8x16xf32>
    %18 = math.exp %17 : vector<4x8x16xf32>
    %cst_16 = arith.constant dense<0.000000e+00> : vector<4x8xf32>
    %19 = vector.multi_reduction <add>, %18, %cst_16 [2] : vector<4x8x16xf32> to vector<4x8xf32>
    %20 = vector.shape_cast %19 : vector<4x8xf32> to vector<4x8x1xf32>
    %21 = tpu.reciprocal %20 {approx = true} : vector<4x8x1xf32> -> vector<4x8x1xf32>
    %22 = vector.broadcast %21 : vector<4x8x1xf32> to vector<4x8x16xf32>
    %23 = arith.mulf %18, %22 : vector<4x8x16xf32>
    %c0_17 = arith.constant 0 : index
    %c0_18 = arith.constant 0 : index
    %c0_19 = arith.constant 0 : index
    %c0_20 = arith.constant 0 : index
    %24 = vector.load %arg7[%c0_17, %c0_18, %c0_19, %c0_20] : memref<1x4x8x16xf32, #tpu.memory_space<vmem>>, vector<1x4x8x16xf32>
    %25 = vector.shape_cast %24 : vector<1x4x8x16xf32> to vector<4x8x16xf32>
    %26 = vector.shape_cast %23 : vector<4x8x16xf32> to vector<1x4x8x16xf32>
    tpu.vector_store %arg7[%c0_17, %c0_18, %c0_19, %c0_20], %26 {strides = array<i32>} : memref<1x4x8x16xf32, #tpu.memory_space<vmem>>, vector<1x4x8x16xf32>,
    %27 = arith.truncf %23 : vector<4x8x16xf32> to vector<4x8x16xbf16>
    "tpu.trace_start"() <{level = 10 : i32, message = "hqk,hkd->hqd"}> : () -> ()
    %cst_21 = arith.constant dense<0.000000e+00> : vector<4x8x8xf32>
    %28 = tpu.matmul %27, %5, %cst_21 {dimension_numbers = #tpu.dot_dimension_numbers<[2], [1], [1], [2], [0, 0, 0, 1, 1, 2], [0], [0]>} : vector<4x8x16xbf16>, vector<4x16x8xbf16>, vector<4x8x8xf32> -> vector<4x8x8xf32>
    "tpu.trace_stop"() : () -> ()
    %29 = arith.truncf %28 : vector<4x8x8xf32> to vector<4x8x8xbf16>
    %c0_22 = arith.constant 0 : index
    %c0_23 = arith.constant 0 : index
    %c0_24 = arith.constant 0 : index
    %c0_25 = arith.constant 0 : index
    %30 = vector.load %arg6[%c0_22, %c0_23, %c0_24, %c0_25] : memref<1x4x8x8xbf16, #tpu.memory_space<vmem>>, vector<1x4x8x8xbf16>
    %31 = vector.shape_cast %30 : vector<1x4x8x8xbf16> to vector<4x8x8xbf16>
    %32 = vector.shape_cast %29 : vector<4x8x8xbf16> to vector<1x4x8x8xbf16>
    tpu.vector_store %arg6[%c0_22, %c0_23, %c0_24, %c0_25], %32 {strides = array<i32>} : memref<1x4x8x8xbf16, #tpu.memory_space<vmem>>, vector<1x4x8x8xbf16>,
    return
  }
  func.func @transform_0(%arg0: i32, %arg1: i32) -> (i32, i32, i32, i32) {
    %c0_i32 = arith.constant 0 : i32
    %c0_i32_0 = arith.constant 0 : i32
    %c0_i32_1 = arith.constant 0 : i32
    return %arg0, %c0_i32, %arg1, %c0_i32_0 : i32, i32, i32, i32
  }
  func.func @transform_1(%arg0: i32, %arg1: i32) -> (i32, i32, i32, i32) {
    %c0_i32 = arith.constant 0 : i32
    %c0_i32_0 = arith.constant 0 : i32
    %c0_i32_1 = arith.constant 0 : i32
    %c0_i32_2 = arith.constant 0 : i32
    return %arg0, %c0_i32, %c0_i32_0, %c0_i32_1 : i32, i32, i32, i32
  }
  func.func @transform_2(%arg0: i32, %arg1: i32) -> (i32, i32, i32, i32) {
    %c0_i32 = arith.constant 0 : i32
    %c0_i32_0 = arith.constant 0 : i32
    %c0_i32_1 = arith.constant 0 : i32
    %c0_i32_2 = arith.constant 0 : i32
    return %arg0, %c0_i32, %c0_i32_0, %c0_i32_1 : i32, i32, i32, i32
  }
  func.func @transform_3(%arg0: i32, %arg1: i32) -> (i32, i32, i32) {
    %c0_i32 = arith.constant 0 : i32
    %c0_i32_0 = arith.constant 0 : i32
    %c0_i32_1 = arith.constant 0 : i32
    return %arg0, %c0_i32, %c0_i32_0 : i32, i32, i32
  }
  func.func @transform_4(%arg0: i32, %arg1: i32) -> (i32, i32, i32, i32) {
    %c0_i32 = arith.constant 0 : i32
    %c0_i32_0 = arith.constant 0 : i32
    %c0_i32_1 = arith.constant 0 : i32
    return %arg0, %c0_i32, %arg1, %c0_i32_0 : i32, i32, i32, i32
  }
  func.func @transform_5(%arg0: i32, %arg1: i32) -> (i32, i32, i32, i32) {
    %c0_i32 = arith.constant 0 : i32
    %c0_i32_0 = arith.constant 0 : i32
    %c0_i32_1 = arith.constant 0 : i32
    return %arg0, %c0_i32, %arg1, %c0_i32_0 : i32, i32, i32, i32
  }
}

module attributes {stable_mosaic.version = 11 : i64} {
  func.func @_ffn_res_ln_kernel(%arg0: i32, %arg1: i32, %arg2: memref<16x32xf32, #tpu.memory_space<vmem>>, %arg3: memref<32x64xbf16, #tpu.memory_space<vmem>>, %arg4: memref<1x64xf32, #tpu.memory_space<vmem>>, %arg5: memref<64x32xbf16, #tpu.memory_space<vmem>>, %arg6: memref<1x32xf32, #tpu.memory_space<vmem>>, %arg7: memref<1x32xf32, #tpu.memory_space<vmem>>, %arg8: memref<1x32xf32, #tpu.memory_space<vmem>>, %arg9: memref<16x32xf32, #tpu.memory_space<vmem>>, %arg10: memref<16x32xf32, #tpu.memory_space<vmem>>) attributes {dimension_semantics = [#tpu.dimension_semantics<parallel>, #tpu.dimension_semantics<arbitrary>], iteration_bounds = array<i64: 1, 1>, scalar_prefetch = 0 : i64, scratch_operands = 1 : i64, tpu.core_type = #tpu.core_type<tc>, window_params = [{transform_indices = @transform_0, window_bounds = array<i64: 16, 32>}, {transform_indices = @transform_1, window_bounds = array<i64: 32, 64>}, {transform_indices = @transform_2, window_bounds = array<i64: 1, 64>}, {transform_indices = @transform_3, window_bounds = array<i64: 64, 32>}, {pipeline_mode = #tpu.pipeline_mode<synchronous>, transform_indices = @transform_4, window_bounds = array<i64: 1, 32>}, {pipeline_mode = #tpu.pipeline_mode<synchronous>, transform_indices = @transform_5, window_bounds = array<i64: 1, 32>}, {pipeline_mode = #tpu.pipeline_mode<synchronous>, transform_indices = @transform_6, window_bounds = array<i64: 1, 32>}, {transform_indices = @transform_7, window_bounds = array<i64: 16, 32>}]} {
    %c0_i32 = arith.constant 0 : i32
    %0 = arith.cmpi eq, %arg1, %c0_i32 : i32
    %1 = arith.extui %0 : i1 to i32
    %c0_i32_0 = arith.constant 0 : i32
    %2 = arith.cmpi ne, %1, %c0_i32_0 : i32
    scf.if %2 {
      %cst_18 = arith.constant 0.000000e+00 : f32
      %27 = vector.broadcast %cst_18 : f32 to vector<16x32xf32>
      %c0_19 = arith.constant 0 : index
      %c0_20 = arith.constant 0 : index
      %28 = vector.load %arg10[%c0_19, %c0_20] : memref<16x32xf32, #tpu.memory_space<vmem>>, vector<16x32xf32>
      tpu.vector_store %arg10[%c0_19, %c0_20], %27 {strides = array<i32>} : memref<16x32xf32, #tpu.memory_space<vmem>>, vector<16x32xf32>,
    } else {
    }
    %c0 = arith.constant 0 : index
    %c0_1 = arith.constant 0 : index
    %3 = vector.load %arg2[%c0, %c0_1] : memref<16x32xf32, #tpu.memory_space<vmem>>, vector<16x32xf32>
    %4 = arith.truncf %3 : vector<16x32xf32> to vector<16x32xbf16>
    %c0_2 = arith.constant 0 : index
    %c0_3 = arith.constant 0 : index
    %5 = vector.load %arg3[%c0_2, %c0_3] : memref<32x64xbf16, #tpu.memory_space<vmem>>, vector<32x64xbf16>
    %cst = arith.constant dense<0.000000e+00> : vector<16x64xf32>
    %6 = tpu.matmul %4, %5, %cst {dimension_numbers = #tpu.dot_dimension_numbers<[1], [0], [0], [1], [0, 0, 1, 1], [], []>} : vector<16x32xbf16>, vector<32x64xbf16>, vector<16x64xf32> -> vector<16x64xf32>
    %c0_4 = arith.constant 0 : index
    %c0_5 = arith.constant 0 : index
    %7 = vector.load %arg4[%c0_4, %c0_5] : memref<1x64xf32, #tpu.memory_space<vmem>>, vector<1x64xf32>
    %8 = vector.broadcast %7 : vector<1x64xf32> to vector<16x64xf32>
    %9 = arith.addf %6, %8 : vector<16x64xf32>
    %cst_6 = arith.constant 5.000000e-01 : f32
    %10 = vector.broadcast %cst_6 : f32 to vector<16x64xf32>
    %11 = arith.mulf %10, %9 : vector<16x64xf32>
    %cst_7 = arith.constant 0.707106769 : f32
    %12 = vector.broadcast %cst_7 : f32 to vector<16x64xf32>
    %13 = arith.mulf %9, %12 : vector<16x64xf32>
    %14 = math.erf %13 : vector<16x64xf32>
    %cst_8 = arith.constant 1.000000e+00 : f32
    %15 = vector.broadcast %cst_8 : f32 to vector<16x64xf32>
    %16 = arith.addf %15, %14 : vector<16x64xf32>
    %17 = arith.mulf %11, %16 : vector<16x64xf32>
    %c0_9 = arith.constant 0 : index
    %c0_10 = arith.constant 0 : index
    %18 = vector.load %arg10[%c0_9, %c0_10] : memref<16x32xf32, #tpu.memory_space<vmem>>, vector<16x32xf32>
    %19 = arith.truncf %17 : vector<16x64xf32> to vector<16x64xbf16>
    %c0_11 = arith.constant 0 : index
    %c0_12 = arith.constant 0 : index
    %20 = vector.load %arg5[%c0_11, %c0_12] : memref<64x32xbf16, #tpu.memory_space<vmem>>, vector<64x32xbf16>
    %cst_13 = arith.constant dense<0.000000e+00> : vector<16x32xf32>
    %21 = tpu.matmul %19, %20, %cst_13 {dimension_numbers = #tpu.dot_dimension_numbers<[1], [0], [0], [1], [0, 0, 1, 1], [], []>} : vector<16x64xbf16>, vector<64x32xbf16>, vector<16x32xf32> -> vector<16x32xf32>
    %22 = arith.addf %18, %21 : vector<16x32xf32>
    %c0_14 = arith.constant 0 : index
    %c0_15 = arith.constant 0 : index
    %23 = vector.load %arg10[%c0_14, %c0_15] : memref<16x32xf32, #tpu.memory_space<vmem>>, vector<16x32xf32>
    tpu.vector_store %arg10[%c0_14, %c0_15], %22 {strides = array<i32>} : memref<16x32xf32, #tpu.memory_space<vmem>>, vector<16x32xf32>,
    %c0_i32_16 = arith.constant 0 : i32
    %24 = arith.cmpi eq, %arg1, %c0_i32_16 : i32
    %25 = arith.extui %24 : i1 to i32
    %c0_i32_17 = arith.constant 0 : i32
    %26 = arith.cmpi ne, %25, %c0_i32_17 : i32
    scf.if %26 {
      %c0_18 = arith.constant 0 : index
      %c0_19 = arith.constant 0 : index
      %27 = vector.load %arg10[%c0_18, %c0_19] : memref<16x32xf32, #tpu.memory_space<vmem>>, vector<16x32xf32>
      %c0_20 = arith.constant 0 : index
      %c0_21 = arith.constant 0 : index
      %28 = vector.load %arg6[%c0_20, %c0_21] : memref<1x32xf32, #tpu.memory_space<vmem>>, vector<1x32xf32>
      %29 = vector.broadcast %28 : vector<1x32xf32> to vector<16x32xf32>
      %30 = arith.addf %27, %29 : vector<16x32xf32>
      %31 = arith.addf %30, %3 : vector<16x32xf32>
      %cst_22 = arith.constant dense<0.000000e+00> : vector<16xf32>
      %32 = vector.multi_reduction <add>, %31, %cst_22 [1] : vector<16x32xf32> to vector<16xf32>
      %33 = vector.shape_cast %32 : vector<16xf32> to vector<16x1xf32>
      %cst_23 = arith.constant 3.200000e+01 : f32
      %34 = vector.broadcast %cst_23 : f32 to vector<16x1xf32>
      %35 = arith.divf %33, %34 : vector<16x1xf32>
      %36 = vector.broadcast %35 : vector<16x1xf32> to vector<16x32xf32>
      %37 = arith.subf %31, %36 : vector<16x32xf32>
      %38 = arith.mulf %37, %37 : vector<16x32xf32>
      %cst_24 = arith.constant dense<0.000000e+00> : vector<16xf32>
      %39 = vector.multi_reduction <add>, %38, %cst_24 [1] : vector<16x32xf32> to vector<16xf32>
      %40 = vector.shape_cast %39 : vector<16xf32> to vector<16x1xf32>
      %cst_25 = arith.constant 3.200000e+01 : f32
      %41 = vector.broadcast %cst_25 : f32 to vector<16x1xf32>
      %42 = arith.divf %40, %41 : vector<16x1xf32>
      %43 = vector.broadcast %35 : vector<16x1xf32> to vector<16x32xf32>
      %44 = arith.subf %31, %43 : vector<16x32xf32>
      %cst_26 = arith.constant 9.99999974E-6 : f32
      %45 = vector.broadcast %cst_26 : f32 to vector<16x1xf32>
      %46 = arith.addf %42, %45 : vector<16x1xf32>
      %47 = math.rsqrt %46 : vector<16x1xf32>
      %48 = vector.broadcast %47 : vector<16x1xf32> to vector<16x32xf32>
      %49 = arith.mulf %44, %48 : vector<16x32xf32>
      %c0_27 = arith.constant 0 : index
      %c0_28 = arith.constant 0 : index
      %50 = vector.load %arg7[%c0_27, %c0_28] : memref<1x32xf32, #tpu.memory_space<vmem>>, vector<1x32xf32>
      %51 = vector.broadcast %50 : vector<1x32xf32> to vector<16x32xf32>
      %52 = arith.mulf %49, %51 : vector<16x32xf32>
      %c0_29 = arith.constant 0 : index
      %c0_30 = arith.constant 0 : index
      %53 = vector.load %arg8[%c0_29, %c0_30] : memref<1x32xf32, #tpu.memory_space<vmem>>, vector<1x32xf32>
      %54 = vector.broadcast %53 : vector<1x32xf32> to vector<16x32xf32>
      %55 = arith.addf %52, %54 : vector<16x32xf32>
      %c0_31 = arith.constant 0 : index
      %c0_32 = arith.constant 0 : index
      %56 = vector.load %arg9[%c0_31, %c0_32] : memref<16x32xf32, #tpu.memory_space<vmem>>, vector<16x32xf32>
      tpu.vector_store %arg9[%c0_31, %c0_32], %55 {strides = array<i32>} : memref<16x32xf32, #tpu.memory_space<vmem>>, vector<16x32xf32>,
    } else {
    }
    return
  }
  func.func @transform_0(%arg0: i32, %arg1: i32) -> (i32, i32) {
    %c0_i32 = arith.constant 0 : i32
    %c0_i32_0 = arith.constant 0 : i32
    return %arg0, %c0_i32 : i32, i32
  }
  func.func @transform_1(%arg0: i32, %arg1: i32) -> (i32, i32) {
    %c0_i32 = arith.constant 0 : i32
    %c0_i32_0 = arith.constant 0 : i32
    return %c0_i32, %arg1 : i32, i32
  }
  func.func @transform_2(%arg0: i32, %arg1: i32) -> (i32, i32) {
    %c0_i32 = arith.constant 0 : i32
    %c0_i32_0 = arith.constant 0 : i32
    return %c0_i32, %arg1 : i32, i32
  }
  func.func @transform_3(%arg0: i32, %arg1: i32) -> (i32, i32) {
    %c0_i32 = arith.constant 0 : i32
    %c0_i32_0 = arith.constant 0 : i32
    return %arg1, %c0_i32 : i32, i32
  }
  func.func @transform_4(%arg0: i32, %arg1: i32) -> (i32, i32) {
    %c0_i32 = arith.constant 0 : i32
    %c0_i32_0 = arith.constant 0 : i32
    %c0_i32_1 = arith.constant 0 : i32
    return %c0_i32, %c0_i32_0 : i32, i32
  }
  func.func @transform_5(%arg0: i32, %arg1: i32) -> (i32, i32) {
    %c0_i32 = arith.constant 0 : i32
    %c0_i32_0 = arith.constant 0 : i32
    %c0_i32_1 = arith.constant 0 : i32
    return %c0_i32, %c0_i32_0 : i32, i32
  }
  func.func @transform_6(%arg0: i32, %arg1: i32) -> (i32, i32) {
    %c0_i32 = arith.constant 0 : i32
    %c0_i32_0 = arith.constant 0 : i32
    %c0_i32_1 = arith.constant 0 : i32
    return %c0_i32, %c0_i32_0 : i32, i32
  }
  func.func @transform_7(%arg0: i32, %arg1: i32) -> (i32, i32) {
    %c0_i32 = arith.constant 0 : i32
    %c0_i32_0 = arith.constant 0 : i32
    return %arg0, %c0_i32 : i32, i32
  }
}

module attributes {stable_mosaic.version = 11 : i64} {
  func.func @_ffn_res_ln_kernel(%arg0: i32, %arg1: i32, %arg2: memref<16x32xf32, #tpu.memory_space<vmem>>, %arg3: memref<32x64xbf16, #tpu.memory_space<vmem>>, %arg4: memref<1x64xf32, #tpu.memory_space<vmem>>, %arg5: memref<64x32xbf16, #tpu.memory_space<vmem>>, %arg6: memref<1x32xf32, #tpu.memory_space<vmem>>, %arg7: memref<1x32xf32, #tpu.memory_space<vmem>>, %arg8: memref<1x32xf32, #tpu.memory_space<vmem>>, %arg9: memref<16x32xf32, #tpu.memory_space<vmem>>, %arg10: memref<16x32xf32, #tpu.memory_space<vmem>>) attributes {dimension_semantics = [#tpu.dimension_semantics<parallel>, #tpu.dimension_semantics<arbitrary>], iteration_bounds = array<i64: 1, 1>, scalar_prefetch = 0 : i64, scratch_operands = 1 : i64, tpu.core_type = #tpu.core_type<tc>, window_params = [{transform_indices = @transform_0, window_bounds = array<i64: 16, 32>}, {transform_indices = @transform_1, window_bounds = array<i64: 32, 64>}, {transform_indices = @transform_2, window_bounds = array<i64: 1, 64>}, {transform_indices = @transform_3, window_bounds = array<i64: 64, 32>}, {pipeline_mode = #tpu.pipeline_mode<synchronous>, transform_indices = @transform_4, window_bounds = array<i64: 1, 32>}, {pipeline_mode = #tpu.pipeline_mode<synchronous>, transform_indices = @transform_5, window_bounds = array<i64: 1, 32>}, {pipeline_mode = #tpu.pipeline_mode<synchronous>, transform_indices = @transform_6, window_bounds = array<i64: 1, 32>}, {transform_indices = @transform_7, window_bounds = array<i64: 16, 32>}]} {
    %c0_i32 = arith.constant 0 : i32
    %0 = arith.cmpi eq, %arg1, %c0_i32 : i32
    %1 = arith.extui %0 : i1 to i32
    %c0_i32_0 = arith.constant 0 : i32
    %2 = arith.cmpi ne, %1, %c0_i32_0 : i32
    scf.if %2 {
      %cst_18 = arith.constant 0.000000e+00 : f32
      %27 = vector.broadcast %cst_18 : f32 to vector<16x32xf32>
      %c0_19 = arith.constant 0 : index
      %c0_20 = arith.constant 0 : index
      %28 = vector.load %arg10[%c0_19, %c0_20] : memref<16x32xf32, #tpu.memory_space<vmem>>, vector<16x32xf32>
      tpu.vector_store %arg10[%c0_19, %c0_20], %27 {strides = array<i32>} : memref<16x32xf32, #tpu.memory_space<vmem>>, vector<16x32xf32>,
    } else {
    }
    %c0 = arith.constant 0 : index
    %c0_1 = arith.constant 0 : index
    %3 = vector.load %arg2[%c0, %c0_1] : memref<16x32xf32, #tpu.memory_space<vmem>>, vector<16x32xf32>
    %4 = arith.truncf %3 : vector<16x32xf32> to vector<16x32xbf16>
    %c0_2 = arith.constant 0 : index
    %c0_3 = arith.constant 0 : index
    %5 = vector.load %arg3[%c0_2, %c0_3] : memref<32x64xbf16, #tpu.memory_space<vmem>>, vector<32x64xbf16>
    %cst = arith.constant dense<0.000000e+00> : vector<16x64xf32>
    %6 = tpu.matmul %4, %5, %cst {dimension_numbers = #tpu.dot_dimension_numbers<[1], [0], [0], [1], [0, 0, 1, 1], [], []>} : vector<16x32xbf16>, vector<32x64xbf16>, vector<16x64xf32> -> vector<16x64xf32>
    %c0_4 = arith.constant 0 : index
    %c0_5 = arith.constant 0 : index
    %7 = vector.load %arg4[%c0_4, %c0_5] : memref<1x64xf32, #tpu.memory_space<vmem>>, vector<1x64xf32>
    %8 = vector.broadcast %7 : vector<1x64xf32> to vector<16x64xf32>
    %9 = arith.addf %6, %8 : vector<16x64xf32>
    %cst_6 = arith.constant 5.000000e-01 : f32
    %10 = vector.broadcast %cst_6 : f32 to vector<16x64xf32>
    %11 = arith.mulf %10, %9 : vector<16x64xf32>
    %cst_7 = arith.constant 0.707106769 : f32
    %12 = vector.broadcast %cst_7 : f32 to vector<16x64xf32>
    %13 = arith.mulf %9, %12 : vector<16x64xf32>
    %14 = math.erf %13 : vector<16x64xf32>
    %cst_8 = arith.constant 1.000000e+00 : f32
    %15 = vector.broadcast %cst_8 : f32 to vector<16x64xf32>
    %16 = arith.addf %15, %14 : vector<16x64xf32>
    %17 = arith.mulf %11, %16 : vector<16x64xf32>
    %c0_9 = arith.constant 0 : index
    %c0_10 = arith.constant 0 : index
    %18 = vector.load %arg10[%c0_9, %c0_10] : memref<16x32xf32, #tpu.memory_space<vmem>>, vector<16x32xf32>
    %19 = arith.truncf %17 : vector<16x64xf32> to vector<16x64xbf16>
    %c0_11 = arith.constant 0 : index
    %c0_12 = arith.constant 0 : index
    %20 = vector.load %arg5[%c0_11, %c0_12] : memref<64x32xbf16, #tpu.memory_space<vmem>>, vector<64x32xbf16>
    %cst_13 = arith.constant dense<0.000000e+00> : vector<16x32xf32>
    %21 = tpu.matmul %19, %20, %cst_13 {dimension_numbers = #tpu.dot_dimension_numbers<[1], [0], [0], [1], [0, 0, 1, 1], [], []>} : vector<16x64xbf16>, vector<64x32xbf16>, vector<16x32xf32> -> vector<16x32xf32>
    %22 = arith.addf %18, %21 : vector<16x32xf32>
    %c0_14 = arith.constant 0 : index
    %c0_15 = arith.constant 0 : index
    %23 = vector.load %arg10[%c0_14, %c0_15] : memref<16x32xf32, #tpu.memory_space<vmem>>, vector<16x32xf32>
    tpu.vector_store %arg10[%c0_14, %c0_15], %22 {strides = array<i32>} : memref<16x32xf32, #tpu.memory_space<vmem>>, vector<16x32xf32>,
    %c0_i32_16 = arith.constant 0 : i32
    %24 = arith.cmpi eq, %arg1, %c0_i32_16 : i32
    %25 = arith.extui %24 : i1 to i32
    %c0_i32_17 = arith.constant 0 : i32
    %26 = arith.cmpi ne, %25, %c0_i32_17 : i32
    scf.if %26 {
      %c0_18 = arith.constant 0 : index
      %c0_19 = arith.constant 0 : index
      %27 = vector.load %arg10[%c0_18, %c0_19] : memref<16x32xf32, #tpu.memory_space<vmem>>, vector<16x32xf32>
      %c0_20 = arith.constant 0 : index
      %c0_21 = arith.constant 0 : index
      %28 = vector.load %arg6[%c0_20, %c0_21] : memref<1x32xf32, #tpu.memory_space<vmem>>, vector<1x32xf32>
      %29 = vector.broadcast %28 : vector<1x32xf32> to vector<16x32xf32>
      %30 = arith.addf %27, %29 : vector<16x32xf32>
      %31 = arith.addf %30, %3 : vector<16x32xf32>
      %cst_22 = arith.constant dense<0.000000e+00> : vector<16xf32>
      %32 = vector.multi_reduction <add>, %31, %cst_22 [1] : vector<16x32xf32> to vector<16xf32>
      %33 = vector.shape_cast %32 : vector<16xf32> to vector<16x1xf32>
      %cst_23 = arith.constant 3.200000e+01 : f32
      %34 = vector.broadcast %cst_23 : f32 to vector<16x1xf32>
      %35 = arith.divf %33, %34 : vector<16x1xf32>
      %36 = vector.broadcast %35 : vector<16x1xf32> to vector<16x32xf32>
      %37 = arith.subf %31, %36 : vector<16x32xf32>
      %38 = arith.mulf %37, %37 : vector<16x32xf32>
      %cst_24 = arith.constant dense<0.000000e+00> : vector<16xf32>
      %39 = vector.multi_reduction <add>, %38, %cst_24 [1] : vector<16x32xf32> to vector<16xf32>
      %40 = vector.shape_cast %39 : vector<16xf32> to vector<16x1xf32>
      %cst_25 = arith.constant 3.200000e+01 : f32
      %41 = vector.broadcast %cst_25 : f32 to vector<16x1xf32>
      %42 = arith.divf %40, %41 : vector<16x1xf32>
      %43 = vector.broadcast %35 : vector<16x1xf32> to vector<16x32xf32>
      %44 = arith.subf %31, %43 : vector<16x32xf32>
      %cst_26 = arith.constant 9.99999974E-6 : f32
      %45 = vector.broadcast %cst_26 : f32 to vector<16x1xf32>
      %46 = arith.addf %42, %45 : vector<16x1xf32>
      %47 = math.rsqrt %46 : vector<16x1xf32>
      %48 = vector.broadcast %47 : vector<16x1xf32> to vector<16x32xf32>
      %49 = arith.mulf %44, %48 : vector<16x32xf32>
      %c0_27 = arith.constant 0 : index
      %c0_28 = arith.constant 0 : index
      %50 = vector.load %arg7[%c0_27, %c0_28] : memref<1x32xf32, #tpu.memory_space<vmem>>, vector<1x32xf32>
      %51 = vector.broadcast %50 : vector<1x32xf32> to vector<16x32xf32>
      %52 = arith.mulf %49, %51 : vector<16x32xf32>
      %c0_29 = arith.constant 0 : index
      %c0_30 = arith.constant 0 : index
      %53 = vector.load %arg8[%c0_29, %c0_30] : memref<1x32xf32, #tpu.memory_space<vmem>>, vector<1x32xf32>
      %54 = vector.broadcast %53 : vector<1x32xf32> to vector<16x32xf32>
      %55 = arith.addf %52, %54 : vector<16x32xf32>
      %c0_31 = arith.constant 0 : index
      %c0_32 = arith.constant 0 : index
      %56 = vector.load %arg9[%c0_31, %c0_32] : memref<16x32xf32, #tpu.memory_space<vmem>>, vector<16x32xf32>
      tpu.vector_store %arg9[%c0_31, %c0_32], %55 {strides = array<i32>} : memref<16x32xf32, #tpu.memory_space<vmem>>, vector<16x32xf32>,
    } else {
    }
    return
  }
  func.func @transform_0(%arg0: i32, %arg1: i32) -> (i32, i32) {
    %c0_i32 = arith.constant 0 : i32
    %c0_i32_0 = arith.constant 0 : i32
    return %arg0, %c0_i32 : i32, i32
  }
  func.func @transform_1(%arg0: i32, %arg1: i32) -> (i32, i32) {
    %c0_i32 = arith.constant 0 : i32
    %c0_i32_0 = arith.constant 0 : i32
    return %c0_i32, %arg1 : i32, i32
  }
  func.func @transform_2(%arg0: i32, %arg1: i32) -> (i32, i32) {
    %c0_i32 = arith.constant 0 : i32
    %c0_i32_0 = arith.constant 0 : i32
    return %c0_i32, %arg1 : i32, i32
  }
  func.func @transform_3(%arg0: i32, %arg1: i32) -> (i32, i32) {
    %c0_i32 = arith.constant 0 : i32
    %c0_i32_0 = arith.constant 0 : i32
    return %arg1, %c0_i32 : i32, i32
  }
  func.func @transform_4(%arg0: i32, %arg1: i32) -> (i32, i32) {
    %c0_i32 = arith.constant 0 : i32
    %c0_i32_0 = arith.constant 0 : i32
    %c0_i32_1 = arith.constant 0 : i32
    return %c0_i32, %c0_i32_0 : i32, i32
  }
  func.func @transform_5(%arg0: i32, %arg1: i32) -> (i32, i32) {
    %c0_i32 = arith.constant 0 : i32
    %c0_i32_0 = arith.constant 0 : i32
    %c0_i32_1 = arith.constant 0 : i32
    return %c0_i32, %c0_i32_0 : i32, i32
  }
  func.func @transform_6(%arg0: i32, %arg1: i32) -> (i32, i32) {
    %c0_i32 = arith.constant 0 : i32
    %c0_i32_0 = arith.constant 0 : i32
    %c0_i32_1 = arith.constant 0 : i32
    return %c0_i32, %c0_i32_0 : i32, i32
  }
  func.func @transform_7(%arg0: i32, %arg1: i32) -> (i32, i32) {
    %c0_i32 = arith.constant 0 : i32
    %c0_i32_0 = arith.constant 0 : i32
    return %arg0, %c0_i32 : i32, i32
  }
}

</mosaic_0001>

<bundles_post_ra>
// kernel: transformer_decoder.16
= control target key start
LH: loop header
LB: loop body
LE: loop exit
PB: predicated region body
PF: predicated region fallthrough
CT: control target
= control target key end

     0   :  { %vm19_vm0 = vcmask 785408   ;;  %v145_v0 = vmov 0.0   ;;  %vm146_vm1 = vmmov 0   ;;  %vm43_vm2 = vcmask 261120   ;;  %s192_s1 = inlined_call_operand.vmem [shape: bf16[32,96], index: 1, kind: input, shape index: {}]   ;;  %s193_s0 = inlined_call_operand.vmem [shape: f32[16,32], index: 0, kind: input, shape index: {}]   ;;  %s194_s2 = inlined_call_operand.vmem [shape: f32[1,96], index: 2, kind: input, shape index: {}]   ;;  %s195_s3 = inlined_call_operand.vmem [shape: bf16[16,96], index: 3, kind: output, shape index: {}]  }
   0x1   :  { %133 = vmatprep.subr.bf16.mxu0 %v145_v0  ;;  %v143_v1 = vld [vmem:[%s192_s1 + $0x8] sm:$0xff]   ;;  %137 = vmatprep.mubr.msk.bf16.mxu0 %vm146_vm1, %v145_v0  ;;  %20 = vst.msk [vmem:[#allocation2] sm:$0xff] %vm19_vm0, %v145_v0  ;;  %21 = vst.msk [vmem:[#allocation2 + $0x8] sm:$0xff] %vm19_vm0, %v145_v0  ;;  %v144_v2 = vld [vmem:[%s192_s1] sm:$0xff]   ;;  %vm115_vm3 = vcmask 781312  }
   0x2   :  { %134 = vmatpush3.bf16.msra.mxu0 %v143_v1  ;;  %v24_v3 = vld [vmem:[%s193_s0] sm:$0xff]  ;;  %v25_v4 = vld [vmem:[%s193_s0 + $0x8] sm:$0xff] }
   0x3   :  { %135 = vmatprep.subr.bf16.mxu0 %v145_v0  ;;  %v26_v5 = vpack.c.bf16 %v25_v4, %v24_v3  ;;  %v125_v14 = vld [vmem:[%s194_s2] ss:$0 sm:$0xff] }
   0x6   :  { %136 = vmatpush3.bf16.msra.mxu0 %v144_v2 }
   0x8   :  { %v22_v6 = vld [vmem:[#allocation2] sm:$0xff]  ;;  %v23_v10 = vld [vmem:[#allocation2 + $0x8] sm:$0xff] }
   0x9   :  { %138 = vmatmul.mubr.msk.bf16.vlgmr.msra.gmra.mxu0 %vm43_vm2, %v26_v5 }
  0xc9   :  { %v81_v7 = vpop.f32.mrf.mxu0 }
  0xca   :  { %v88_v8 = vadd.f32 %v81_v7, %v22_v6 }
  0xcb   :  { %v139_v9 = vpop.f32.mrf.mxu0 }
  0xcc   :  { %91 = vst.msk [vmem:[#allocation2] sm:$0xff] %vm19_vm0, %v88_v8 }
  0xcd   :  { %v84_v11 = vpop.f32.mrf.mxu0 }
  0xce   :  { %v89_v12 = vadd.f32 %v84_v11, %v23_v10 }
  0xcf   :  { %v140_v13 = vpop.f32.mrf.mxu0 }
  0xd0   :  { %92 = vst.msk [vmem:[#allocation2 + $0x8] sm:$0xff] %vm19_vm0, %v89_v12 }
  0xd3   :  { %v96_v15 = vld [vmem:[#allocation2] sm:$0xff] }
  0xd4   :  { %v105_v16 = vadd.f32 %v125_v14, %v96_v15 }
  0xd6   :  { %v128_v17 = vpack.c.bf16 %v105_v16, %v105_v16 }
  0xd7   :  { %v97_v18 = vld [vmem:[#allocation2 + $0x8] sm:$0xff] }
  0xd8   :  { %116 = vst.msk [vmem:[%s195_s3] sm:$0xf] %vm115_vm3, %v128_v17  ;;  %v106_v19 = vadd.f32 %v125_v14, %v97_v18 }
  0xda   :  { %v129_v20 = vpack.c.bf16 %v106_v19, %v106_v19 }
  0xdc   :  { %117 = vst.msk [vmem:[%s195_s3 + $0x4] sm:$0xf] %vm115_vm3, %v129_v20 }

// kernel: transformer_decoder.19
= control target key start
LH: loop header
LB: loop body
LE: loop exit
PB: predicated region body
PF: predicated region fallthrough
CT: control target
= control target key end

     0   :  { %vm19_vm0 = vcmask 261120   ;;  %v144_v0 = vmov 0.0   ;;  %vm145_vm1 = vmmov 0   ;;  %vm114_vm2 = vcmask 257024   ;;  %s192_s1 = inlined_call_operand.vmem [shape: bf16[32,32], index: 1, kind: input, shape index: {}]   ;;  %s193_s0 = inlined_call_operand.vmem [shape: f32[16,32], index: 0, kind: input, shape index: {}]   ;;  %s194_s2 = inlined_call_operand.vmem [shape: f32[1,32], index: 2, kind: input, shape index: {}]   ;;  %s195_s3 = inlined_call_operand.vmem [shape: bf16[16,32], index: 3, kind: output, shape index: {}]  }
   0x1   :  { %132 = vmatprep.subr.bf16.mxu0 %v144_v0  ;;  %v142_v1 = vld [vmem:[%s192_s1 + $0x8] sm:$0xff]   ;;  %136 = vmatprep.mubr.msk.bf16.mxu0 %vm145_vm1, %v144_v0  ;;  %20 = vst.msk [vmem:[#allocation2] sm:$0xff] %vm19_vm0, %v144_v0  ;;  %21 = vst.msk [vmem:[#allocation2 + $0x8] sm:$0xff] %vm19_vm0, %v144_v0  ;;  %v143_v2 = vld [vmem:[%s192_s1] sm:$0xff]  }
   0x2   :  { %133 = vmatpush3.bf16.msra.mxu0 %v142_v1  ;;  %v24_v3 = vld [vmem:[%s193_s0] sm:$0xff]  ;;  %v25_v4 = vld [vmem:[%s193_s0 + $0x8] sm:$0xff] }
   0x3   :  { %134 = vmatprep.subr.bf16.mxu0 %v144_v0  ;;  %v26_v5 = vpack.c.bf16 %v25_v4, %v24_v3  ;;  %v124_v14 = vld [vmem:[%s194_s2] ss:$0 sm:$0xff] }
   0x6   :  { %135 = vmatpush3.bf16.msra.mxu0 %v143_v2 }
   0x8   :  { %v22_v6 = vld [vmem:[#allocation2] sm:$0xff]  ;;  %v23_v10 = vld [vmem:[#allocation2 + $0x8] sm:$0xff] }
   0x9   :  { %137 = vmatmul.mubr.msk.bf16.vlgmr.msra.gmra.mxu0 %vm19_vm0, %v26_v5 }
  0xc9   :  { %v81_v7 = vpop.f32.mrf.mxu0 }
  0xca   :  { %v88_v8 = vadd.f32 %v81_v7, %v22_v6 }
  0xcb   :  { %v138_v9 = vpop.f32.mrf.mxu0 }
  0xcc   :  { %90 = vst.msk [vmem:[#allocation2] sm:$0xff] %vm19_vm0, %v88_v8 }
  0xcd   :  { %v84_v11 = vpop.f32.mrf.mxu0 }
  0xce   :  { %v89_v12 = vadd.f32 %v84_v11, %v23_v10 }
  0xcf   :  { %v139_v13 = vpop.f32.mrf.mxu0 }
  0xd0   :  { %91 = vst.msk [vmem:[#allocation2 + $0x8] sm:$0xff] %vm19_vm0, %v89_v12 }
  0xd3   :  { %v95_v15 = vld [vmem:[#allocation2] sm:$0xff] }
  0xd4   :  { %v104_v16 = vadd.f32 %v124_v14, %v95_v15 }
  0xd6   :  { %v127_v17 = vpack.c.bf16 %v104_v16, %v104_v16 }
  0xd7   :  { %v96_v18 = vld [vmem:[#allocation2 + $0x8] sm:$0xff] }
  0xd8   :  { %115 = vst.msk [vmem:[%s195_s3] sm:$0xf] %vm114_vm2, %v127_v17  ;;  %v105_v19 = vadd.f32 %v124_v14, %v96_v18 }
  0xda   :  { %v128_v20 = vpack.c.bf16 %v105_v19, %v105_v19 }
  0xdc   :  { %116 = vst.msk [vmem:[%s195_s3 + $0x4] sm:$0xf] %vm114_vm2, %v128_v20 }

// kernel: transformer_decoder.18
= control target key start
LH: loop header
LB: loop body
LE: loop exit
PB: predicated region body
PF: predicated region fallthrough
CT: control target
= control target key end

     0   :  { %vm28_vm0 = vcmask 261120   ;;  %v201_v0 = vmov 0.0   ;;  %vm202_vm1 = vmmov 0   ;;  %s279_s1 = inlined_call_operand.vmem [shape: bf16[32,32], index: 1, kind: input, shape index: {}]   ;;  %s280_s0 = inlined_call_operand.vmem [shape: bf16[16,32], index: 0, kind: input, shape index: {}]   ;;  %s281_s2 = inlined_call_operand.vmem [shape: f32[1,32], index: 2, kind: input, shape index: {}]   ;;  %s282_s3 = inlined_call_operand.vmem [shape: f32[16,32], index: 3, kind: input, shape index: {}]   ;;  %s283_s4 = inlined_call_operand.vmem [shape: f32[1,32], index: 4, kind: input, shape index: {}]   ;;  %s284_s5 = inlined_call_operand.vmem [shape: f32[1,32], index: 5, kind: input, shape index: {}]   ;;  %s285_s6 = inlined_call_operand.vmem [shape: f32[16,32], index: 6, kind: output, shape index: {}]  }
   0x1   :  { %184 = vmatprep.subr.bf16.mxu0 %v201_v0  ;;  %v194_v1 = vld [vmem:[%s279_s1 + $0x8] sm:$0xff]   ;;  %188 = vmatprep.mubr.msk.bf16.mxu0 %vm202_vm1, %v201_v0  ;;  %29 = vst.msk [vmem:[#allocation2] sm:$0xff] %vm28_vm0, %v201_v0  ;;  %30 = vst.msk [vmem:[#allocation2 + $0x8] sm:$0xff] %vm28_vm0, %v201_v0  ;;  %v195_v2 = vld [vmem:[%s279_s1] sm:$0xff]  }
   0x2   :  { %185 = vmatpush3.bf16.msra.mxu0 %v194_v1  ;;  %v196_v3 = vld [vmem:[%s280_s0] sm:$0xff]   ;;  %v120_v18 = vld [vmem:[%s282_s3 + $0x8] sm:$0xff] }
   0x3   :  { %186 = vmatprep.subr.bf16.mxu0 %v201_v0  ;;  %v178_v12 = vld [vmem:[%s281_s2] ss:$0 sm:$0xff] }
   0x4   :  { %v119_v14 = vld [vmem:[%s282_s3] sm:$0xff] }
   0x5   :  { %v179_v40 = vld [vmem:[%s283_s4] ss:$0 sm:$0xff] }
   0x6   :  { %187 = vmatpush3.bf16.msra.mxu0 %v195_v2  ;;  %v180_v42 = vld [vmem:[%s284_s5] ss:$0 sm:$0xff] }
   0x8   :  { %v31_v4 = vld [vmem:[#allocation2] sm:$0xff]  ;;  %v32_v8 = vld [vmem:[#allocation2 + $0x8] sm:$0xff] }
   0x9   :  { %189 = vmatmul.mubr.msk.bf16.vlgmr.msra.gmra.mxu0 %vm28_vm0, %v196_v3 }
  0xc9   :  { %v94_v5 = vpop.f32.mrf.mxu0 }
  0xca   :  { %v101_v6 = vadd.f32 %v94_v5, %v31_v4 }
  0xcb   :  { %v190_v7 = vpop.f32.mrf.mxu0 }
  0xcc   :  { %103 = vst.msk [vmem:[#allocation2] sm:$0xff] %vm28_vm0, %v101_v6 }
  0xcd   :  { %v97_v9 = vpop.f32.mrf.mxu0 }
  0xce   :  { %v102_v10 = vadd.f32 %v97_v9, %v32_v8 }
  0xcf   :  { %v191_v11 = vpop.f32.mrf.mxu0 }
  0xd0   :  { %104 = vst.msk [vmem:[#allocation2 + $0x8] sm:$0xff] %vm28_vm0, %v102_v10 }
  0xd3   :  { %v108_v13 = vld [vmem:[#allocation2] sm:$0xff] }
  0xd4   :  { %v117_v15 = vadd.f32 %v178_v12, %v108_v13 }
  0xd6   :  { %v121_v16 = vadd.f32 %v119_v14, %v117_v15 }
  0xd7   :  { %v109_v17 = vld [vmem:[#allocation2 + $0x8] sm:$0xff] }
  0xd8   :  { %v123_v19 = vsel %vm28_vm0, %v121_v16, 0.0  ;;  %v118_v20 = vadd.f32 %v178_v12, %v109_v17 }
  0xd9   :  { %124 = vadd.xlane.f32.xlu0 %v123_v19 }
  0xda   :  { %v122_v21 = vadd.f32 %v120_v18, %v118_v20 }
  0xdc   :  { %v126_v22 = vsel %vm28_vm0, %v122_v21, 0.0 }
  0xdd   :  { %127 = vadd.xlane.f32.xlu0 %v126_v22 }
 0x162   :  { %v125_v23 = vpop.xlane.xlu0 %124 }
 0x163   :  { %v130_v24 = vmul.f32 0.03125, %v125_v23 }
 0x165   :  { %v132_v25 = vsub.f32 %v121_v16, %v130_v24 }
 0x166   :  { %v128_v26 = vpop.xlane.xlu0 %127 }
 0x167   :  { %v131_v27 = vmul.f32 0.03125, %v128_v26  ;;  %v134_v28 = vmul.f32 %v132_v25, %v132_v25 }
 0x169   :  { %v133_v29 = vsub.f32 %v122_v21, %v131_v27  ;;  %v136_v30 = vsel %vm28_vm0, %v134_v28, 0.0 }
 0x16a   :  { %137 = vadd.xlane.f32.xlu1 %v136_v30 }
 0x16b   :  { %v135_v31 = vmul.f32 %v133_v29, %v133_v29 }
 0x16d   :  { %v139_v32 = vsel %vm28_vm0, %v135_v31, 0.0 }
 0x16e   :  { %140 = vadd.xlane.f32.xlu1 %v139_v32 }
 0x1f3   :  { %v138_v33 = vpop.xlane.xlu1 %137 }
 0x1f4   :  { %v142_v34 = vmul.f32 0.03125, %v138_v33 }
 0x1f6   :  { %v144_v35 = vadd.f32 1e-05, %v142_v34 }
 0x1f7   :  { %v141_v36 = vpop.xlane.xlu1 %140 }
 0x1f8   :  { %197 = vrsqrt.f32 %v144_v35  ;;  %v143_v37 = vmul.f32 0.03125, %v141_v36 }
 0x1fa   :  { %v145_v38 = vadd.f32 1e-05, %v143_v37 }
 0x1fc   :  { %199 = vrsqrt.f32 %v145_v38 }
 0x205   :  { %v198_v39 = vpop.eup %197 }
 0x206   :  { %v148_v41 = vmul.f32 %v198_v39, %v132_v25 }
 0x208   :  { %v157_v43 = vmul.f32 %v179_v40, %v148_v41 }
 0x209   :  { %v200_v44 = vpop.eup %199 }
 0x20a   :  { %v166_v45 = vadd.f32 %v180_v42, %v157_v43  ;;  %v149_v46 = vmul.f32 %v200_v44, %v133_v29 }
 0x20c   :  { %168 = vst.msk [vmem:[%s285_s6] sm:$0xff] %vm28_vm0, %v166_v45  ;;  %v158_v47 = vmul.f32 %v179_v40, %v149_v46 }
 0x20e   :  { %v167_v48 = vadd.f32 %v180_v42, %v158_v47 }
 0x210   :  { %169 = vst.msk [vmem:[%s285_s6 + $0x8] sm:$0xff] %vm28_vm0, %v167_v48 }

// kernel: transformer_decoder.17
= control target key start
LH: loop header
LB: loop body
LE: loop exit
PB: predicated region body
PF: predicated region fallthrough
CT: control target
= control target key end

     0   :  { %11 = vsyncpa [#allocation3], 0  ;;  %s1427_s0 = inlined_call_operand.vmem [shape: bf16[2,4,8,8], index: 0, kind: input, shape index: {}]   ;;  %s1428_s1 = inlined_call_operand.vmem [shape: bf16[2,4,8,8], index: 1, kind: input, shape index: {}]   ;;  %s1429_s2 = inlined_call_operand.vmem [shape: bf16[2,4,8,8], index: 2, kind: input, shape index: {}]   ;;  %s1430_s3 = inlined_call_operand.vmem [shape: f32[1,8,8], index: 3, kind: input, shape index: {}]   ;;  %s1431_s4 = inlined_call_operand.vmem [shape: bf16[2,4,8,8], index: 4, kind: output, shape index: {0}]   ;;  %s1432_s5 = inlined_call_operand.hbm [shape: f32[2,4,8,8], index: 5, kind: output, shape index: {1}]  }
   0x1   :  { %13 = vsyncpa [#allocation3 + $0x1], 0  ;;  %s1239_s18 = smov 0   ;;  %s1241_s19 = smov 0  }
   0x2   :  { %s1243_s20 = smov 0   ;;  %s1245_s21 = smov 0  }
   0x3   :  { %s1247_s22 = smov 0   ;;  %s1249_s23 = smov 0  }
   0x4 LB: > { %s954_s24 = sadd.s32 4294967295, %s1202_s23   ;;  %s955_s25 = sadd.s32 4294967294, %s1202_s23   ;;  %s1202_s23 = sphi %s1249_s23, %s19_s23   ;;  %s1198_s22 = sphi %s1247_s22, %s1439_s22   ;;  %s1194_s21 = sphi %s1245_s21, %s1438_s21   ;;  %s1190_s20 = sphi %s1243_s20, %s1437_s20   ;;  %s1186_s19 = sphi %s1241_s19, %s1436_s19   ;;  %s1182_s18 = sphi %s1239_s18, %s1435_s18  }
   0x5   : > { %s31_s26 = sadd.s32 1, %s1198_s22  ;;  %s174_s27 = sadd.s32 1, %s1190_s20 }
   0x6   : > { %p33_p0 = scmp.ge.s32.totalorder %s31_s26, 2  ;;  %p184_p1 = scmp.ne.s32.totalorder %s1190_s20, %s1186_s19 }
   0x7   : > { %p185_p2 = scmp.eq.s32.totalorder %s954_s24, 1  ;;  %p190_p3 = scmp.ne.s32.totalorder %s1186_s19, %s1182_s18 }
   0x8   : > { %s1441_s26 = smov (%p33_p0, %s31_s26), 0  ;;  %p191_p5 = scmp.eq.s32.totalorder %s955_s25, 1 }
   0x9   : > { %p1279_p4 = por %p185_p2, %p184_p1  ;;  %s169_s29 = ssub.s32 %s1198_s22, %s1441_s26 }
   0xa   : > { %p959_p6 = scmp.ge.s32.totalorder %s1202_s23, 1  ;;  %p172_p7 = scmp.eq.s32.totalorder %s169_s29, 0 }
   0xb   : > { %p1286_p8 = por %p191_p5, %p190_p3  ;;  %p243_p9 = scmp.lt.s32.totalorder %s1202_s23, 3 }
   0xc   : > { %s1292_s6 = scalar_select %p172_p7, %s1190_s20, %s174_s27  }
   0xd   : > { %p244_p10 = pnand %p959_p6, %p243_p9 }
   0xe   : > { %p296_p11 = scmp.lt.s32.totalorder (!%p244_p10), %s1194_s21, 1  ;;  %s293_s27 = sand.u32 (!%p244_p10), 1, %s1186_s19  }
   0xf   : > { %247 = sbr.rel (%p244_p10) target bundleno = 755 (0x2f3), region = 36  ;;  %s960_s29 = sshll.u32 (!%p244_p10), %s293_s27, 5 }
  0x10   : > { %s986_s9 = sshll.u32 (!%p244_p10), %s1194_s21, 9 }
  0x11   : > { %s1368_s13 = scalar_lea.hbm (!%p244_p10), %s1432_s5, %s986_s9 }
  0x14   : > { %v1204_v0 = vmov 0.0   ;;  %s297_s7 = scalar_select %p296_p11, %s1194_s21, 1  ;;  %vm1205_vm0 = vmmov 0   ;;  %vm340_vm1 = vcmask 64512   ;;  %v339_v13 = vld [vmem:[%s1430_s3] sm:$0xff]  ;;  %vm584_vm2 = vcmask 1043456  }
  0x15   : > { %1003 = vmatprep.subr.bf16.mxu0 %v1204_v0  ;;  %1009 = vmatprep.subr.bf16.mxu1 %v1204_v0  ;;  %s1206_s21 = smov [#allocation2]  }
  0x16   : > { %1005 = vmatprep.mubr.msk.bf16.mxu0 %vm1205_vm0, %v1204_v0  ;;  %1011 = vmatprep.mubr.msk.bf16.mxu1 %vm1205_vm0, %v1204_v0  ;;  %s1302_s8 = sshll.u32 %s297_s7, 4  ;;  %s295_s7 = scalar_lea.vmem [#allocation2], %s960_s29 }
  0x17   : > { %s308_s11 = scalar_lea.vmem %s1428_s1, %s1302_s8  ;;  %s303_s14 = scalar_lea.vmem %s1427_s0, %s1302_s8 }
  0x18   : > { %v331_v1 = vld [vmem:[%s308_s11] sm:$0xf]  ;;  %v332_v2 = vld [vmem:[%s308_s11 + $0x4] sm:$0xf]  ;;  %v333_v5 = vld [vmem:[%s308_s11 + $0x8] sm:$0xf]  ;;  %s313_s25 = scalar_lea.vmem %s1429_s2, %s1302_s8 }
  0x19   : > { %v345_v3 = vsel %vm340_vm1, %v331_v1, 0  ;;  %v391_v4 = vsel %vm340_vm1, %v332_v2, 0  ;;  %v334_v6 = vld [vmem:[%s308_s11 + $0xc] sm:$0xf]  ;;  %v327_v7 = vld [vmem:[%s303_s14] sm:$0xf] }
  0x1a   : > { %1004 = vmatpush3.bf16.xpose.msra.mxu0 %v345_v3  ;;  %1010 = vmatpush3.bf16.xpose.msra.mxu1 %v391_v4  ;;  %v328_v8 = vld [vmem:[%s303_s14 + $0x4] sm:$0xf]  ;;  %v437_v9 = vsel %vm340_vm1, %v333_v5, 0  ;;  %v483_v10 = vsel %vm340_vm1, %v334_v6, 0  ;;  %v329_v11 = vld [vmem:[%s303_s14 + $0x8] sm:$0xf] }
  0x1b   : > { %1015 = vmatprep.subr.bf16.mxu0 %v1204_v0  ;;  %1021 = vmatprep.subr.bf16.mxu1 %v1204_v0  ;;  %v330_v12 = vld [vmem:[%s303_s14 + $0xc] sm:$0xf]  ;;  %v335_v62 = vld [vmem:[%s313_s25] sm:$0xf]  ;;  %v336_v1 = vld [vmem:[%s313_s25 + $0x4] sm:$0xf] }
  0x1c   : > { %v586_v63 = vsel %vm584_vm2, %v335_v62, 0  ;;  %v632_v2 = vsel %vm584_vm2, %v336_v1, 0  ;;  %v337_v3 = vld [vmem:[%s313_s25 + $0x8] sm:$0xf]  ;;  %v338_v5 = vld [vmem:[%s313_s25 + $0xc] sm:$0xf] }
  0x1d   : > { %v678_v4 = vsel %vm584_vm2, %v337_v3, 0  ;;  %v724_v6 = vsel %vm584_vm2, %v338_v5, 0  ;;  %s801_s10 = sshll.u32 %s295_s7, 4  ;;  %s1374_s14 = scalar_lea.sflag [#allocation3], %s293_s27  ;;  %s1370_s10 = int_to_ptr.vmem [resolvable:$true] %s801_s10 }
  0x1e   : > { %s1126_s15 = scalar_lea.vmem %s1370_s10, 512  ;;  %s1130_s16 = sshll.u32 %s1206_s21, 4  ;;  %s1131_s16 = int_to_ptr.vmem [resolvable:$false] %s1130_s16 }
  0x1f   : > { %p1127_p12 = scmp.ne.s32.totalorder %s1370_s10, %s1126_s15  ;;  %s1132_s17 = scalar_lea.vmem %s1131_s16, 1024 }
  0x20   : > { %p1133_p1 = scmp.lt.s32.totalorder %s1370_s10, %s1131_s16  ;;  %p1134_p2 = scmp.lt.s32.totalorder %s1132_s17, %s1126_s15 }
  0x21   : > { %1006 = vmatmul.mubr.msk.bf16.vlgmr.msra.gmra.mxu0 %vm340_vm1, %v327_v7  ;;  %1012 = vmatmul.mubr.msk.bf16.vlgmr.msra.gmra.mxu1 %vm340_vm1, %v328_v8  ;;  %p1128_p13 = pnand %p1127_p12, %p1279_p4 }
  0x22   : > { %1016 = vmatpush3.bf16.xpose.msra.mxu0 %v437_v9  ;;  %1022 = vmatpush3.bf16.xpose.msra.mxu1 %v483_v10  ;;  %p1135_p3 = por %p1134_p2, %p1133_p1 }
  0x23   : > { %1017 = vmatprep.mubr.msk.bf16.mxu0 %vm1205_vm0, %v1204_v0  ;;  %1023 = vmatprep.mubr.msk.bf16.mxu1 %vm1205_vm0, %v1204_v0  ;;  %p1129_p0 = pneg %p1128_p13 }
  0x24   : > { %1027 = vmatprep.subr.bf16.mxu0 %v1204_v0  ;;  %1033 = vmatprep.subr.bf16.mxu1 %v1204_v0 }
  0x25   : > { %p1136_p5 = pnand %p1135_p3, %p1129_p0 }
  0x29   : > { %1018 = vmatmul.mubr.msk.bf16.vlgmr.msra.gmra.mxu0 %vm340_vm1, %v329_v11  ;;  %1024 = vmatmul.mubr.msk.bf16.vlgmr.msra.gmra.mxu1 %vm340_vm1, %v330_v12 }
  0x2a   : > { %1029 = vmatprep.mubr.msk.bf16.mxu0 %vm1205_vm0, %v1204_v0  ;;  %1035 = vmatprep.mubr.msk.bf16.mxu1 %vm1205_vm0, %v1204_v0 }
  0x2b   : > { %1028 = vmatpush3.bf16.msra.mxu0 %v586_v63  ;;  %1034 = vmatpush3.bf16.msra.mxu1 %v632_v2 }
  0x2c   : > { %1039 = vmatprep.subr.bf16.mxu0 %v1204_v0  ;;  %1045 = vmatprep.subr.bf16.mxu1 %v1204_v0 }
  0xe1   : > { %v381_v14 = vpop.f32.mrf.mxu0  ;;  %v427_v15 = vpop.f32.mrf.mxu1 }
  0xe2   : > { %v382_v16 = vadd.f32 %v381_v14, %v339_v13  ;;  %v428_v17 = vadd.f32 %v427_v15, %v339_v13 }
  0xe3   : > { %v1007_v18 = vpop.f32.mrf.mxu0  ;;  %v1013_v19 = vpop.f32.mrf.mxu1 }
  0xe4   : > { %v525_v20 = vmul.f32 0.35355338, %v382_v16  ;;  %v526_v21 = vmul.f32 0.35355338, %v428_v17 }
  0xe5   : > { %v384_v22 = vpop.f32.mrf.mxu0  ;;  %v430_v23 = vpop.f32.mrf.mxu1 }
  0xe6   : > { %v529_v24 = vsel %vm340_vm1, %v525_v20, -inf  ;;  %v532_v27 = vsel %vm340_vm1, %v526_v21, -inf }
  0xe7   : > { %v1014_v25 = vpop.f32.mrf.mxu1  ;;  %530 = vmax.xlane.f32.xlu0 %v529_v24  ;;  %v1008_v26 = vpop.f32.mrf.mxu0 }
  0xe9   : > { %v473_v28 = vpop.f32.mrf.mxu0  ;;  %v519_v29 = vpop.f32.mrf.mxu1 }
  0xea   : > { %v474_v30 = vadd.f32 %v473_v28, %v339_v13  ;;  %v520_v31 = vadd.f32 %v519_v29, %v339_v13 }
  0xeb   : > { %v1025_v32 = vpop.f32.mrf.mxu1  ;;  %533 = vmax.xlane.f32.xlu0 %v532_v27  ;;  %v1019_v33 = vpop.f32.mrf.mxu0 }
  0xec   : > { %v527_v34 = vmul.f32 0.35355338, %v474_v30  ;;  %v528_v35 = vmul.f32 0.35355338, %v520_v31 }
  0xed   : > { %v476_v36 = vpop.f32.mrf.mxu0  ;;  %v522_v37 = vpop.f32.mrf.mxu1 }
  0xee   : > { %v535_v38 = vsel %vm340_vm1, %v527_v34, -inf  ;;  %v538_v41 = vsel %vm340_vm1, %v528_v35, -inf }
  0xef   : > { %v1026_v39 = vpop.f32.mrf.mxu1  ;;  %536 = vmax.xlane.f32.xlu1 %v535_v38  ;;  %v1020_v40 = vpop.f32.mrf.mxu0 }
  0xf3   : > { %539 = vmax.xlane.f32.xlu1 %v538_v41 }
 0x170   : > { %v531_v42 = vpop.xlane.xlu0 %530 }
 0x171   : > { %v541_v43 = vsub.f32 %v525_v20, %v531_v42 }
 0x173   : > { %v545_v44 = vmul.f32 1.442695, %v541_v43 }
 0x174   : > { %v534_v45 = vpop.xlane.xlu0 %533 }
 0x175   : > { %1110 = vpow2.f32 %v545_v44  ;;  %v542_v46 = vsub.f32 %v526_v21, %v534_v45 }
 0x177   : > { %v547_v47 = vmul.f32 1.442695, %v542_v46 }
 0x178   : > { %v537_v48 = vpop.xlane.xlu1 %536 }
 0x179   : > { %1112 = vpow2.f32 %v547_v47  ;;  %v543_v49 = vsub.f32 %v527_v34, %v537_v48 }
 0x17b   : > { %v549_v50 = vmul.f32 1.442695, %v543_v49 }
 0x17c   : > { %v540_v51 = vpop.xlane.xlu1 %539 }
 0x17d   : > { %1114 = vpow2.f32 %v549_v50  ;;  %v544_v52 = vsub.f32 %v528_v35, %v540_v51 }
 0x17f   : > { %v551_v53 = vmul.f32 1.442695, %v544_v52 }
 0x181   : > { %1116 = vpow2.f32 %v551_v53 }
 0x182   : > { %v1111_v54 = vpop.eup %1110 }
 0x183   : > { %v553_v55 = vsel %vm340_vm1, %v1111_v54, 0.0 }
 0x184   : > { %554 = vadd.xlane.f32.xlu0 %v553_v55 }
 0x186   : > { %v1113_v56 = vpop.eup %1112 }
 0x187   : > { %v556_v57 = vsel %vm340_vm1, %v1113_v56, 0.0 }
 0x188   : > { %557 = vadd.xlane.f32.xlu1 %v556_v57 }
 0x18a   : > { %v1115_v58 = vpop.eup %1114 }
 0x18b   : > { %v559_v59 = vsel %vm340_vm1, %v1115_v58, 0.0 }
 0x18c   : > { %560 = vadd.xlane.f32.xlu0 %v559_v59 }
 0x18e   : > { %v1117_v60 = vpop.eup %1116 }
 0x18f   : > { %v562_v61 = vsel %vm340_vm1, %v1117_v60, 0.0 }
 0x190   : > { %563 = vadd.xlane.f32.xlu1 %v562_v61 }
 0x20d   : > { %v555_v7 = vpop.xlane.xlu0 %554 }
 0x20e   : > { %1118 = vrcp.f32 %v555_v7 }
 0x211   : > { %v558_v8 = vpop.xlane.xlu1 %557 }
 0x212   : > { %1120 = vrcp.f32 %v558_v8 }
 0x215   : > { %v561_v9 = vpop.xlane.xlu0 %560 }
 0x216   : > { %1122 = vrcp.f32 %v561_v9 }
 0x219   : > { %v564_v10 = vpop.xlane.xlu1 %563 }
 0x21a   : > { %1124 = vrcp.f32 %v564_v10 }
 0x21b   : > { %v1119_v11 = vpop.eup %1118 }
 0x21c   : > { %v569_v12 = vmul.f32 %v1119_v11, %v1111_v54 }
 0x21e   : > { %573 = vst.msk [vmem:[%s295_s7] sm:$0xff] %vm340_vm1, %v569_v12  ;;  %v577_v13 = vpack.c.bf16 %v569_v12, %v569_v12 }
 0x21f   : > { %v1121_v14 = vpop.eup %1120 }
 0x220   : > { %1030 = vmatmul.mubr.msk.bf16.vlgmr.msra.gmra.mxu0 %vm340_vm1, %v577_v13  ;;  %v570_v15 = vmul.f32 %v1121_v14, %v1113_v56 }
 0x221   : > { %1040 = vmatpush3.bf16.msra.mxu0 %v678_v4  ;;  %1041 = vmatprep.mubr.msk.bf16.mxu0 %vm1205_vm0, %v1204_v0 }
 0x222   : > { %574 = vst.msk [vmem:[%s295_s7 + $0x8] sm:$0xff] %vm340_vm1, %v570_v15  ;;  %v578_v16 = vpack.c.bf16 %v570_v15, %v570_v15 }
 0x223   : > { %v1123_v17 = vpop.eup %1122 }
 0x224   : > { %v571_v18 = vmul.f32 %v1123_v17, %v1115_v58  ;;  %1036 = vmatmul.mubr.msk.bf16.vlgmr.msra.gmra.mxu1 %vm340_vm1, %v578_v16 }
 0x225   : > { %1046 = vmatpush3.bf16.msra.mxu1 %v724_v6  ;;  %1047 = vmatprep.mubr.msk.bf16.mxu1 %vm1205_vm0, %v1204_v0 }
 0x226   : > { %575 = vst.msk [vmem:[%s295_s7 + $0x10] sm:$0xff] %vm340_vm1, %v571_v18  ;;  %v579_v19 = vpack.c.bf16 %v571_v18, %v571_v18 }
 0x227   : > { %v1125_v20 = vpop.eup %1124 }
 0x228   : > { %v572_v21 = vmul.f32 %v1125_v20, %v1117_v60  ;;  %1042 = vmatmul.mubr.msk.bf16.vlgmr.msra.gmra.mxu0 %vm340_vm1, %v579_v19 }
 0x22a   : > { %576 = vst.msk [vmem:[%s295_s7 + $0x18] sm:$0xff] %vm340_vm1, %v572_v21  ;;  %v580_v22 = vpack.c.bf16 %v572_v21, %v572_v21 }
 0x22c   : > { %1048 = vmatmul.mubr.msk.bf16.vlgmr.msra.gmra.mxu1 %vm340_vm1, %v580_v22 }
 0x22d   : > { %1139 = shalt.err (!%p1136_p5)
}
 0x22e   : > { %s1140_s24 = scalar_lea.hbm %s1368_s13, 512  ;;  %s1144_s29 = scalar_lea.hbm %s1432_s5, 1024 }
 0x22f   : > { %p1141_p6 = scmp.ne.s32.totalorder %s1368_s13, %s1140_s24  ;;  %p1145_p10 = scmp.lt.s32.totalorder %s1368_s13, %s1432_s5 }
 0x230   : > { %p1146_p11 = scmp.lt.s32.totalorder %s1144_s29, %s1140_s24 }
 0x231   : > { %p1142_p7 = pnand %p1141_p6, %p1279_p4 }
 0x232   : > { %p1147_p12 = por %p1146_p11, %p1145_p10 }
 0x233   : > { %p1143_p9 = pneg %p1142_p7 }
 0x235   : > { %p1148_p13 = pnand %p1147_p12, %p1143_p9 }
 0x237   : > { %1151 = shalt.err (!%p1148_p13)
}
 0x238   : > { %s1207_s11 = smov 128   ;;  %s1208_s12 = smov 8   ;;  %vm770_vm3 = vcmask 60416  }
 0x239   : > { %1051 = dma.vmem_to_hbm [thread:$0]  (%p1279_p4), %s1370_s10, 512, %s1368_s13, %s1374_s14, %s1207_s11, %s1207_s11, %s1208_s12  }
 0x23a   : > { %s325_s16 = scalar_lea.vmem %s1431_s4, %s1302_s8 }
 0x2e0   : > { %v622_v0 = vpop.f32.mrf.mxu0 }
 0x2e1   : > { %v766_v23 = vpack.c.bf16 %v622_v0, %v622_v0 }
 0x2e2   : > { %v1031_v24 = vpop.f32.mrf.mxu0 }
 0x2e3   : > { %771 = vst.msk [vmem:[%s325_s16] sm:$0xf] %vm770_vm3, %v766_v23 }
 0x2e4   : > { %v625_v25 = vpop.f32.mrf.mxu0  ;;  %v668_v26 = vpop.f32.mrf.mxu1 }
 0x2e5   : > { %v767_v27 = vpack.c.bf16 %v668_v26, %v668_v26 }
 0x2e6   : > { %v1032_v28 = vpop.f32.mrf.mxu0  ;;  %v1037_v29 = vpop.f32.mrf.mxu1 }
 0x2e7   : > { %772 = vst.msk [vmem:[%s325_s16 + $0x4] sm:$0xf] %vm770_vm3, %v767_v27 }
 0x2e8   : > { %v671_v30 = vpop.f32.mrf.mxu1  ;;  %v714_v31 = vpop.f32.mrf.mxu0 }
 0x2e9   : > { %v768_v32 = vpack.c.bf16 %v714_v31, %v714_v31 }
 0x2ea   : > { %v1038_v33 = vpop.f32.mrf.mxu1  ;;  %v1043_v34 = vpop.f32.mrf.mxu0 }
 0x2eb   : > { %773 = vst.msk [vmem:[%s325_s16 + $0x8] sm:$0xf] %vm770_vm3, %v768_v32 }
 0x2ec   : > { %v717_v35 = vpop.f32.mrf.mxu0  ;;  %v760_v36 = vpop.f32.mrf.mxu1 }
 0x2ed   : > { %v769_v37 = vpack.c.bf16 %v760_v36, %v760_v36 }
 0x2ee   : > { %v1044_v38 = vpop.f32.mrf.mxu0  ;;  %v1049_v39 = vpop.f32.mrf.mxu1 }
 0x2ef   : > { %774 = vst.msk [vmem:[%s325_s16 + $0xc] sm:$0xf] %vm770_vm3, %v769_v37 }
 0x2f0   : > { %v763_v40 = vpop.f32.mrf.mxu1 }
 0x2f2   : > { %v1050_v41 = vpop.f32.mrf.mxu1 }
 0x2f3 PF: > { %p1057_p4 = scmp.ge.s32.totalorder %s1202_s23, 2  ;;  %s827_s28 = sand.u32 1, %s1182_s18  }
 0x2f4   : > { %s828_s8 = scalar_lea.sflag [#allocation3], %s827_s28 }
 0x2f5   : > { %p1054_p0 = pnand %p1057_p4, %p1286_p8 }
 0x2f7   : > { %p1055_p1 = pneg %p1054_p0 }
 0x2f9   : > { %1177 = dma.done.wait (%p1055_p1), %s828_s8, 512  }
 0x2fa   : > { %1179 = vsyncadd (%p1055_p1), %s828_s8, 4294966784  ;;  %s19_s23 = sadd.s32 1, %s1202_s23   ;;  %s1435_s18 = smov %s1186_s19 }
 0x2fb   : > { %p16_p2 = scmp.ge.s32.totalorder %s19_s23, 4   ;;  %s1436_s19 = smov %s1190_s20 }
 0x2fc   : > { %s1437_s20 = smov %s1292_s6  ;;  %s1438_s21 = smov %s1198_s22 }
 0x2fd   : > { %s1439_s22 = smov %s1441_s26  ;;  %18 = sbr.rel (!%p16_p2) target bundleno = 4 (0x4), region = 92 }
 0x302   :  { %833 = vsyncpa [#allocation3], 1 }
 0x303   :  { %835 = vsyncpa [#allocation3 + $0x1], 1 }

// kernel: transformer_decoder.20
= control target key start
LH: loop header
LB: loop body
LE: loop exit
PB: predicated region body
PF: predicated region fallthrough
CT: control target
= control target key end

     0   :  { %vm19_vm0 = vcmask 523264   ;;  %v186_v1 = vmov 0.0   ;;  %vm50_vm1 = vcmask 261120   ;;  %vm149_vm2 = vcmask 519168   ;;  %s248_s1 = inlined_call_operand.vmem [shape: bf16[32,64], index: 1, kind: input, shape index: {}]   ;;  %s249_s0 = inlined_call_operand.vmem [shape: f32[32,32], index: 0, kind: input, shape index: {}]   ;;  %s250_s2 = inlined_call_operand.vmem [shape: f32[1,64], index: 2, kind: input, shape index: {}]   ;;  %s251_s3 = inlined_call_operand.vmem [shape: bf16[32,64], index: 3, kind: output, shape index: {}]  }
   0x1   :  { %v184_v0 = vld [vmem:[%s248_s1 + $0x8] sm:$0xff]   ;;  %22 = vst.msk [vmem:[#allocation2 + $0x10] sm:$0xff] %vm19_vm0, %v186_v1  ;;  %20 = vst.msk [vmem:[#allocation2] sm:$0xff] %vm19_vm0, %v186_v1  ;;  %v185_v2 = vld [vmem:[%s248_s1] sm:$0xff]  }
   0x2   :  { %21 = vst.msk [vmem:[#allocation2 + $0x8] sm:$0xff] %vm19_vm0, %v186_v1  ;;  %23 = vst.msk [vmem:[#allocation2 + $0x18] sm:$0xff] %vm19_vm0, %v186_v1  ;;  %175 = vmatprep.subr.bf16.mxu0 %v184_v0  ;;  %v28_v3 = vld [vmem:[%s249_s0] sm:$0xff]  ;;  %v29_v4 = vld [vmem:[%s249_s0 + $0x8] sm:$0xff] }
   0x3   :  { %176 = vmatpush3.bf16.msra.mxu0 %v184_v0  ;;  %v32_v5 = vpack.c.bf16 %v29_v4, %v28_v3  ;;  %v30_v6 = vld [vmem:[%s249_s0 + $0x10] sm:$0xff]  ;;  %v31_v7 = vld [vmem:[%s249_s0 + $0x18] sm:$0xff]  ;;  %v162_v21 = vld [vmem:[%s250_s2] ss:$0 sm:$0xff] }
   0x4   :  { %177 = vmatprep.subr.bf16.mxu0 %v185_v2  ;;  %v33_v8 = vpack.c.bf16 %v31_v7, %v30_v6 }
   0x5   :  { %179 = vmatprep.mubr.msk.bf16.mxu0 %vm50_vm1, %v32_v5 }
   0x7   :  { %178 = vmatpush3.bf16.msra.mxu0 %v185_v2 }
   0x8   :  { %v26_v9 = vld [vmem:[#allocation2 + $0x10] sm:$0xff]  ;;  %v24_v11 = vld [vmem:[#allocation2] sm:$0xff] }
   0x9   :  { %v27_v14 = vld [vmem:[#allocation2 + $0x18] sm:$0xff]  ;;  %v25_v17 = vld [vmem:[#allocation2 + $0x8] sm:$0xff] }
   0xa   :  { %180 = vmatmul.mubr.msk.bf16.vlgmr.msra.gmra.mxu0 %vm50_vm1, %v33_v8 }
  0xca   :  { %v181_v10 = vpop.f32.mrf.mxu0 }
  0xcb   :  { %v108_v12 = vadd.f32 %v181_v10, %v26_v9 }
  0xcc   :  { %v91_v13 = vpop.f32.mrf.mxu0 }
  0xcd   :  { %113 = vst.msk [vmem:[#allocation2 + $0x10] sm:$0xff] %vm19_vm0, %v108_v12  ;;  %v106_v15 = vadd.f32 %v91_v13, %v24_v11 }
  0xce   :  { %v182_v16 = vpop.f32.mrf.mxu0 }
  0xcf   :  { %111 = vst.msk [vmem:[#allocation2] sm:$0xff] %vm19_vm0, %v106_v15  ;;  %v109_v18 = vadd.f32 %v182_v16, %v27_v14 }
  0xd0   :  { %v94_v19 = vpop.f32.mrf.mxu0 }
  0xd1   :  { %114 = vst.msk [vmem:[#allocation2 + $0x18] sm:$0xff] %vm19_vm0, %v109_v18  ;;  %v107_v20 = vadd.f32 %v94_v19, %v25_v17 }
  0xd3   :  { %112 = vst.msk [vmem:[#allocation2 + $0x8] sm:$0xff] %vm19_vm0, %v107_v20 }
  0xd4   :  { %v120_v22 = vld [vmem:[#allocation2 + $0x10] sm:$0xff] }
  0xd5   :  { %v131_v23 = vadd.f32 %v162_v21, %v120_v22 }
  0xd6   :  { %v118_v24 = vld [vmem:[#allocation2] sm:$0xff] }
  0xd7   :  { %v169_v25 = vpack.c.bf16 %v131_v23, %v131_v23  ;;  %v129_v26 = vadd.f32 %v162_v21, %v118_v24 }
  0xd8   :  { %v121_v27 = vld [vmem:[#allocation2 + $0x18] sm:$0xff] }
  0xd9   :  { %152 = vst.msk [vmem:[%s251_s3 + $0x8] sm:$0xf] %vm149_vm2, %v169_v25  ;;  %v167_v28 = vpack.c.bf16 %v129_v26, %v129_v26  ;;  %v132_v29 = vadd.f32 %v162_v21, %v121_v27 }
  0xda   :  { %v119_v30 = vld [vmem:[#allocation2 + $0x8] sm:$0xff] }
  0xdb   :  { %150 = vst.msk [vmem:[%s251_s3] sm:$0xf] %vm149_vm2, %v167_v28  ;;  %v170_v31 = vpack.c.bf16 %v132_v29, %v132_v29  ;;  %v130_v32 = vadd.f32 %v162_v21, %v119_v30 }
  0xdd   :  { %153 = vst.msk [vmem:[%s251_s3 + $0xc] sm:$0xf] %vm149_vm2, %v170_v31  ;;  %v168_v33 = vpack.c.bf16 %v130_v32, %v130_v32 }
  0xdf   :  { %151 = vst.msk [vmem:[%s251_s3 + $0x4] sm:$0xf] %vm149_vm2, %v168_v33 }

// kernel: transformer_decoder.23
= control target key start
LH: loop header
LB: loop body
LE: loop exit
PB: predicated region body
PF: predicated region fallthrough
CT: control target
= control target key end

     0   :  { %vm31_vm0 = vcmask 261120   ;;  %v322_v0 = vmov 0.0   ;;  %vm323_vm1 = vmmov 0   ;;  %vm150_vm2 = vcmask 523264   ;;  %s417_s1 = inlined_call_operand.vmem [shape: bf16[32,64], index: 1, kind: input, shape index: {}]   ;;  %s418_s0 = inlined_call_operand.vmem [shape: f32[16,32], index: 0, kind: input, shape index: {}]   ;;  %s419_s3 = inlined_call_operand.vmem [shape: bf16[64,32], index: 3, kind: input, shape index: {}]   ;;  %s420_s2 = inlined_call_operand.vmem [shape: f32[1,64], index: 2, kind: input, shape index: {}]   ;;  %s421_s4 = inlined_call_operand.vmem [shape: f32[1,32], index: 4, kind: input, shape index: {}]   ;;  %s422_s5 = inlined_call_operand.vmem [shape: f32[1,32], index: 5, kind: input, shape index: {}]   ;;  %s423_s6 = inlined_call_operand.vmem [shape: f32[1,32], index: 6, kind: input, shape index: {}]   ;;  %s424_s7 = inlined_call_operand.vmem [shape: f32[16,32], index: 7, kind: output, shape index: {}]  }
   0x1   :  { %286 = vmatprep.subr.bf16.mxu0 %v322_v0  ;;  %v308_v1 = vld [vmem:[%s417_s1 + $0x8] sm:$0xff]   ;;  %290 = vmatprep.mubr.msk.bf16.mxu0 %vm323_vm1, %v322_v0  ;;  %32 = vst.msk [vmem:[#allocation2] sm:$0xff] %vm31_vm0, %v322_v0  ;;  %33 = vst.msk [vmem:[#allocation2 + $0x8] sm:$0xff] %vm31_vm0, %v322_v0  ;;  %v309_v2 = vld [vmem:[%s417_s1] sm:$0xff]  }
   0x2   :  { %294 = vmatprep.subr.bf16.mxu1 %v322_v0  ;;  %302 = vmatprep.mubr.msk.bf16.mxu1 %vm323_vm1, %v322_v0  ;;  %v34_v3 = vld [vmem:[%s418_s0] sm:$0xff]  ;;  %v35_v4 = vld [vmem:[%s418_s0 + $0x8] sm:$0xff]  ;;  %v310_v6 = vld [vmem:[%s419_s3 + $0x18] sm:$0xff]  }
   0x3   :  { %287 = vmatpush3.bf16.msra.mxu0 %v308_v1  ;;  %v36_v5 = vpack.c.bf16 %v35_v4, %v34_v3  ;;  %295 = vmatpush3.bf16.msra.mxu1 %v310_v6  ;;  %v311_v7 = vld [vmem:[%s419_s3 + $0x10] sm:$0xff]   ;;  %v312_v8 = vld [vmem:[%s419_s3 + $0x8] sm:$0xff]   ;;  %v313_v9 = vld [vmem:[%s419_s3] sm:$0xff]  }
   0x4   :  { %288 = vmatprep.subr.bf16.mxu0 %v322_v0  ;;  %296 = vmatprep.subr.bf16.mxu1 %v322_v0  ;;  %v266_v10 = vld [vmem:[%s420_s2] ss:$0 sm:$0xff] }
   0x5   :  { %v275_v36 = vld [vmem:[%s421_s4] ss:$0 sm:$0xff] }
   0x6   :  { %v276_v62 = vld [vmem:[%s422_s5] ss:$0 sm:$0xff] }
   0x7   :  { %289 = vmatpush3.bf16.msra.mxu0 %v309_v2  ;;  %297 = vmatpush3.bf16.msra.mxu1 %v311_v7 }
   0x8   :  { %298 = vmatprep.subr.bf16.mxu1 %v322_v0  ;;  %v115_v28 = vld [vmem:[#allocation2] sm:$0xff]  ;;  %v116_v32 = vld [vmem:[#allocation2 + $0x8] sm:$0xff] }
   0xa   :  { %291 = vmatmul.mubr.msk.bf16.vlgmr.msra.gmra.mxu0 %vm31_vm0, %v36_v5 }
   0xb   :  { %299 = vmatpush3.bf16.msra.mxu1 %v312_v8 }
   0xc   :  { %300 = vmatprep.subr.bf16.mxu1 %v322_v0  ;;  %v277_v0 = vld [vmem:[%s423_s6] ss:$0 sm:$0xff] }
   0xf   :  { %301 = vmatpush3.bf16.msra.mxu1 %v313_v9 }
  0xca   :  { %v98_v11 = vpop.f32.mrf.mxu0 }
  0xcb   :  { %v99_v12 = vadd.f32 %v266_v10, %v98_v11 }
  0xcc   :  { %v292_v13 = vpop.f32.mrf.mxu0 }
  0xcd   :  { %v107_v14 = vmul.f32 0.70710677, %v99_v12  ;;  %v105_v22 = vmul.f32 0.5, %v99_v12 }
  0xce   :  { %v101_v15 = vpop.f32.mrf.mxu0 }
  0xcf   :  { %314 = verf.f32 %v107_v14  ;;  %v102_v16 = vadd.f32 %v266_v10, %v101_v15 }
  0xd0   :  { %v293_v17 = vpop.f32.mrf.mxu0 }
  0xd1   :  { %v108_v18 = vmul.f32 0.70710677, %v102_v16  ;;  %v106_v23 = vmul.f32 0.5, %v102_v16 }
  0xd3   :  { %316 = verf.f32 %v108_v18 }
  0xdc   :  { %v315_v19 = vpop.eup %314 }
  0xdd   :  { %v111_v20 = vadd.f32 1.0, %v315_v19 }
  0xdf   :  { %v113_v25 = vmul.f32 %v111_v20, %v105_v22 }
  0xe0   :  { %v317_v21 = vpop.eup %316 }
  0xe1   :  { %v112_v24 = vadd.f32 1.0, %v317_v21 }
  0xe3   :  { %v114_v26 = vmul.f32 %v112_v24, %v106_v23 }
  0xe5   :  { %v117_v27 = vpack.c.bf16 %v114_v26, %v113_v25 }
  0xe7   :  { %303 = vmatmul.mubr.msk.bf16.vlgmr.msra.gmra.mxu1 %vm150_vm2, %v117_v27 }
 0x1a7   :  { %v188_v29 = vpop.f32.mrf.mxu1 }
 0x1a8   :  { %v195_v30 = vadd.f32 %v188_v29, %v115_v28 }
 0x1a9   :  { %v304_v31 = vpop.f32.mrf.mxu1 }
 0x1aa   :  { %197 = vst.msk [vmem:[#allocation2] sm:$0xff] %vm31_vm0, %v195_v30 }
 0x1ab   :  { %v191_v33 = vpop.f32.mrf.mxu1 }
 0x1ac   :  { %v196_v34 = vadd.f32 %v191_v33, %v116_v32 }
 0x1ad   :  { %v305_v35 = vpop.f32.mrf.mxu1 }
 0x1ae   :  { %198 = vst.msk [vmem:[#allocation2 + $0x8] sm:$0xff] %vm31_vm0, %v196_v34 }
 0x1b1   :  { %v202_v37 = vld [vmem:[#allocation2] sm:$0xff] }
 0x1b2   :  { %v211_v38 = vadd.f32 %v275_v36, %v202_v37 }
 0x1b4   :  { %v213_v39 = vadd.f32 %v211_v38, %v34_v3 }
 0x1b5   :  { %v203_v40 = vld [vmem:[#allocation2 + $0x8] sm:$0xff] }
 0x1b6   :  { %v215_v41 = vsel %vm31_vm0, %v213_v39, 0.0  ;;  %v212_v42 = vadd.f32 %v275_v36, %v203_v40 }
 0x1b7   :  { %216 = vadd.xlane.f32.xlu0 %v215_v41 }
 0x1b8   :  { %v214_v43 = vadd.f32 %v212_v42, %v35_v4 }
 0x1ba   :  { %v218_v44 = vsel %vm31_vm0, %v214_v43, 0.0 }
 0x1bb   :  { %219 = vadd.xlane.f32.xlu0 %v218_v44 }
 0x240   :  { %v217_v45 = vpop.xlane.xlu0 %216 }
 0x241   :  { %v222_v46 = vmul.f32 0.03125, %v217_v45 }
 0x243   :  { %v224_v47 = vsub.f32 %v213_v39, %v222_v46 }
 0x244   :  { %v220_v48 = vpop.xlane.xlu0 %219 }
 0x245   :  { %v223_v49 = vmul.f32 0.03125, %v220_v48  ;;  %v226_v50 = vmul.f32 %v224_v47, %v224_v47 }
 0x247   :  { %v225_v51 = vsub.f32 %v214_v43, %v223_v49  ;;  %v228_v52 = vsel %vm31_vm0, %v226_v50, 0.0 }
 0x248   :  { %229 = vadd.xlane.f32.xlu1 %v228_v52 }
 0x249   :  { %v227_v53 = vmul.f32 %v225_v51, %v225_v51 }
 0x24b   :  { %v231_v54 = vsel %vm31_vm0, %v227_v53, 0.0 }
 0x24c   :  { %232 = vadd.xlane.f32.xlu1 %v231_v54 }
 0x2d1   :  { %v230_v55 = vpop.xlane.xlu1 %229 }
 0x2d2   :  { %v234_v56 = vmul.f32 0.03125, %v230_v55 }
 0x2d4   :  { %v236_v57 = vadd.f32 1e-05, %v234_v56 }
 0x2d5   :  { %v233_v58 = vpop.xlane.xlu1 %232 }
 0x2d6   :  { %318 = vrsqrt.f32 %v236_v57  ;;  %v235_v59 = vmul.f32 0.03125, %v233_v58 }
 0x2d8   :  { %v237_v60 = vadd.f32 1e-05, %v235_v59 }
 0x2da   :  { %320 = vrsqrt.f32 %v237_v60 }
 0x2e3   :  { %v319_v61 = vpop.eup %318 }
 0x2e4   :  { %v240_v63 = vmul.f32 %v319_v61, %v224_v47 }
 0x2e6   :  { %v249_v1 = vmul.f32 %v276_v62, %v240_v63 }
 0x2e7   :  { %v321_v2 = vpop.eup %320 }
 0x2e8   :  { %v258_v3 = vadd.f32 %v277_v0, %v249_v1  ;;  %v241_v4 = vmul.f32 %v321_v2, %v225_v51 }
 0x2ea   :  { %260 = vst.msk [vmem:[%s424_s7] sm:$0xff] %vm31_vm0, %v258_v3  ;;  %v250_v5 = vmul.f32 %v276_v62, %v241_v4 }
 0x2ec   :  { %v259_v6 = vadd.f32 %v277_v0, %v250_v5 }
 0x2ee   :  { %261 = vst.msk [vmem:[%s424_s7 + $0x8] sm:$0xff] %vm31_vm0, %v259_v6 }

// kernel: transformer_decoder.21
= control target key start
LH: loop header
LB: loop body
LE: loop exit
PB: predicated region body
PF: predicated region fallthrough
CT: control target
= control target key end

     0   :  { %11 = vsyncpa [#allocation3], 0  ;;  %s1489_s0 = inlined_call_operand.vmem [shape: bf16[2,4,8,8], index: 0, kind: input, shape index: {}]   ;;  %s1490_s1 = inlined_call_operand.vmem [shape: bf16[2,4,16,8], index: 1, kind: input, shape index: {}]   ;;  %s1491_s2 = inlined_call_operand.vmem [shape: bf16[2,4,16,8], index: 2, kind: input, shape index: {}]   ;;  %s1492_s3 = inlined_call_operand.vmem [shape: f32[2,1,16], index: 3, kind: input, shape index: {}]   ;;  %s1493_s4 = inlined_call_operand.vmem [shape: bf16[2,4,8,8], index: 4, kind: output, shape index: {0}]   ;;  %s1494_s5 = inlined_call_operand.hbm [shape: f32[2,4,8,16], index: 5, kind: output, shape index: {1}]  }
   0x1   :  { %13 = vsyncpa [#allocation3 + $0x1], 0  ;;  %s1292_s18 = smov 0   ;;  %s1294_s19 = smov 0  }
   0x2   :  { %s1296_s20 = smov 0   ;;  %s1298_s21 = smov 0  }
   0x3   :  { %s1300_s22 = smov 0   ;;  %s1302_s23 = smov 0  }
   0x4 LB: > { %s991_s24 = sadd.s32 4294967295, %s1255_s23   ;;  %s992_s25 = sadd.s32 4294967294, %s1255_s23   ;;  %s1255_s23 = sphi %s1302_s23, %s19_s23   ;;  %s1251_s22 = sphi %s1300_s22, %s1501_s22   ;;  %s1247_s21 = sphi %s1298_s21, %s1500_s21   ;;  %s1243_s20 = sphi %s1296_s20, %s1499_s20   ;;  %s1239_s19 = sphi %s1294_s19, %s1498_s19   ;;  %s1235_s18 = sphi %s1292_s18, %s1497_s18  }
   0x5   : > { %s31_s26 = sadd.s32 1, %s1251_s22  ;;  %s174_s27 = sadd.s32 1, %s1243_s20 }
   0x6   : > { %p33_p0 = scmp.ge.s32.totalorder %s31_s26, 2  ;;  %p184_p1 = scmp.ne.s32.totalorder %s1243_s20, %s1239_s19 }
   0x7   : > { %p185_p2 = scmp.eq.s32.totalorder %s991_s24, 1  ;;  %p190_p3 = scmp.ne.s32.totalorder %s1239_s19, %s1235_s18 }
   0x8   : > { %s1503_s26 = smov (%p33_p0, %s31_s26), 0  ;;  %p191_p5 = scmp.eq.s32.totalorder %s992_s25, 1 }
   0x9   : > { %p1332_p4 = por %p185_p2, %p184_p1  ;;  %s169_s29 = ssub.s32 %s1251_s22, %s1503_s26 }
   0xa   : > { %p995_p6 = scmp.ge.s32.totalorder %s1255_s23, 1  ;;  %p172_p7 = scmp.eq.s32.totalorder %s169_s29, 0 }
   0xb   : > { %p1339_p8 = por %p191_p5, %p190_p3  ;;  %p242_p9 = scmp.lt.s32.totalorder %s1255_s23, 3 }
   0xc   : > { %s1345_s6 = scalar_select %p172_p7, %s1243_s20, %s174_s27  }
   0xd   : > { %p243_p10 = pnand %p995_p6, %p242_p9 }
   0xe   : > { %p294_p11 = scmp.lt.s32.totalorder (!%p243_p10), %s1247_s21, 1 }
   0xf   : > { %246 = sbr.rel (%p243_p10) target bundleno = 755 (0x2f3), region = 36 }
  0x14   : > { %v1257_v0 = vmov 0.0   ;;  %s1351_s7 = scalar_select %p294_p11, %s1247_s21, 1  ;;  %vm1258_vm0 = vmmov 0   ;;  %vm356_vm1 = vcmask 64512   ;;  %vm560_vm2 = vcmask 130048  }
  0x15   : > { %1048 = vmatprep.subr.bf16.mxu0 %v1257_v0  ;;  %1054 = vmatprep.subr.bf16.mxu1 %v1257_v0 }
  0x16   : > { %1050 = vmatprep.mubr.msk.bf16.mxu0 %vm1258_vm0, %v1257_v0  ;;  %1056 = vmatprep.mubr.msk.bf16.mxu1 %vm1258_vm0, %v1257_v0  ;;  %s1028_s8 = sshll.u32 %s1351_s7, 5  ;;  %s1027_s12 = sshll.u32 %s1351_s7, 4 }
  0x17   : > { %s306_s11 = scalar_lea.vmem %s1490_s1, %s1028_s8  ;;  %s301_s15 = scalar_lea.vmem %s1489_s0, %s1027_s12 }
  0x18   : > { %v1155_v1 = vld [vmem:[%s306_s11] sm:$0xff]   ;;  %v1156_v2 = vld [vmem:[%s306_s11 + $0x8] sm:$0xff]   ;;  %v1157_v4 = vld [vmem:[%s306_s11 + $0x10] sm:$0xff]   ;;  %s1373_s24 = scalar_lea.vmem %s1491_s2, %s1028_s8  ;;  %s314_s29 = scalar_lea.vmem %s1492_s3, %s1351_s7 }
  0x19   : > { %v361_v3 = vsel %vm356_vm1, %v1155_v1, 0  ;;  %v412_v5 = vsel %vm356_vm1, %v1156_v2, 0  ;;  %v324_v6 = vld [vmem:[%s301_s15] sm:$0xf]  ;;  %v1158_v7 = vld [vmem:[%s306_s11 + $0x18] sm:$0xff]   ;;  %v463_v9 = vsel %vm356_vm1, %v1157_v4, 0 }
  0x1a   : > { %1049 = vmatpush3.bf16.xpose.msra.mxu0 %v361_v3  ;;  %1055 = vmatpush3.bf16.xpose.msra.mxu1 %v412_v5  ;;  %v325_v8 = vld [vmem:[%s301_s15 + $0x4] sm:$0xf]  ;;  %v514_v10 = vsel %vm356_vm1, %v1158_v7, 0  ;;  %v326_v11 = vld [vmem:[%s301_s15 + $0x8] sm:$0xf]  ;;  %s291_s8 = sand.u32 1, %s1239_s19  }
  0x1b   : > { %1060 = vmatprep.subr.bf16.mxu0 %v1257_v0  ;;  %1066 = vmatprep.subr.bf16.mxu1 %v1257_v0  ;;  %v327_v12 = vld [vmem:[%s301_s15 + $0xc] sm:$0xf]  ;;  %v1005_v13 = vld [vmem:[%s314_s29] ss:$0 sm:$0xff]  ;;  %s996_s9 = sshll.u32 %s291_s8, 5  ;;  %v1161_v7 = vld [vmem:[%s1373_s24 + $0x10] sm:$0xff]  }
  0x1c   : > { %v1159_v62 = vld [vmem:[%s1373_s24] sm:$0xff]   ;;  %v1160_v63 = vld [vmem:[%s1373_s24 + $0x8] sm:$0xff]   ;;  %s293_s10 = scalar_lea.vmem [#allocation2], %s996_s9  ;;  %s1031_s11 = sshll.u32 %s1247_s21, 9 }
  0x1d   : > { %s844_s13 = sshll.u32 %s293_s10, 4  ;;  %s1429_s16 = scalar_lea.hbm %s1494_s5, %s1031_s11  ;;  %s1431_s13 = int_to_ptr.vmem [resolvable:$true] %s844_s13 }
  0x1e   : > { %s1435_s17 = scalar_lea.sflag [#allocation3], %s291_s8  ;;  %s1259_s21 = smov [#allocation2]  }
  0x1f   : > { %s1183_s25 = sshll.u32 %s1259_s21, 4  ;;  %s1184_s25 = int_to_ptr.vmem [resolvable:$false] %s1183_s25 }
  0x20   : > { %s1185_s27 = scalar_lea.vmem %s1184_s25, 1024  ;;  %p1186_p1 = scmp.lt.s32.totalorder %s1431_s13, %s1184_s25 }
  0x21   : > { %1051 = vmatmul.mubr.msk.bf16.vlgmr.msra.gmra.mxu0 %vm356_vm1, %v324_v6  ;;  %1057 = vmatmul.mubr.msk.bf16.vlgmr.msra.gmra.mxu1 %vm356_vm1, %v325_v8 }
  0x22   : > { %1061 = vmatpush3.bf16.xpose.msra.mxu0 %v463_v9  ;;  %1067 = vmatpush3.bf16.xpose.msra.mxu1 %v514_v10 }
  0x23   : > { %1062 = vmatprep.mubr.msk.bf16.mxu0 %vm1258_vm0, %v1257_v0  ;;  %1068 = vmatprep.mubr.msk.bf16.mxu1 %vm1258_vm0, %v1257_v0 }
  0x24   : > { %1072 = vmatprep.subr.bf16.mxu0 %v1257_v0  ;;  %1078 = vmatprep.subr.bf16.mxu1 %v1257_v0 }
  0x29   : > { %1063 = vmatmul.mubr.msk.bf16.vlgmr.msra.gmra.mxu0 %vm356_vm1, %v326_v11  ;;  %1069 = vmatmul.mubr.msk.bf16.vlgmr.msra.gmra.mxu1 %vm356_vm1, %v327_v12  ;;  %v1162_v11 = vld [vmem:[%s1373_s24 + $0x18] sm:$0xff]   ;;  %s1179_s24 = scalar_lea.vmem %s1431_s13, 512 }
  0x2a   : > { %1074 = vmatprep.mubr.msk.bf16.mxu0 %vm1258_vm0, %v1257_v0  ;;  %1080 = vmatprep.mubr.msk.bf16.mxu1 %vm1258_vm0, %v1257_v0  ;;  %p1180_p12 = scmp.ne.s32.totalorder %s1431_s13, %s1179_s24  ;;  %p1187_p2 = scmp.lt.s32.totalorder %s1185_s27, %s1179_s24 }
  0x2b   : > { %1073 = vmatpush3.bf16.msra.mxu0 %v1159_v62  ;;  %1079 = vmatpush3.bf16.msra.mxu1 %v1160_v63 }
  0x2c   : > { %1084 = vmatprep.subr.bf16.mxu0 %v1257_v0  ;;  %1090 = vmatprep.subr.bf16.mxu1 %v1257_v0  ;;  %p1181_p13 = pnand %p1180_p12, %p1332_p4  ;;  %p1188_p3 = por %p1187_p2, %p1186_p1 }
  0x2e   : > { %p1182_p0 = pneg %p1181_p13 }
  0x30   : > { %p1189_p5 = pnand %p1188_p3, %p1182_p0 }
  0xe1   : > { %v397_v14 = vpop.f32.mrf.mxu0  ;;  %v448_v16 = vpop.f32.mrf.mxu1 }
  0xe2   : > { %v398_v15 = vadd.f32 %v1005_v13, %v397_v14  ;;  %v449_v17 = vadd.f32 %v1005_v13, %v448_v16 }
  0xe3   : > { %v1052_v18 = vpop.f32.mrf.mxu0  ;;  %v1058_v20 = vpop.f32.mrf.mxu1 }
  0xe4   : > { %v556_v19 = vmul.f32 0.25, %v398_v15  ;;  %v557_v21 = vmul.f32 0.25, %v449_v17 }
  0xe5   : > { %v400_v22 = vpop.f32.mrf.mxu0  ;;  %v451_v23 = vpop.f32.mrf.mxu1 }
  0xe6   : > { %v561_v24 = vsel %vm560_vm2, %v556_v19, -inf  ;;  %v564_v27 = vsel %vm560_vm2, %v557_v21, -inf }
  0xe7   : > { %562 = vmax.xlane.f32.xlu0 %v561_v24  ;;  %v1053_v25 = vpop.f32.mrf.mxu0  ;;  %v1059_v26 = vpop.f32.mrf.mxu1 }
  0xe9   : > { %v499_v28 = vpop.f32.mrf.mxu0  ;;  %v550_v30 = vpop.f32.mrf.mxu1 }
  0xea   : > { %v500_v29 = vadd.f32 %v1005_v13, %v499_v28  ;;  %v551_v31 = vadd.f32 %v1005_v13, %v550_v30 }
  0xeb   : > { %565 = vmax.xlane.f32.xlu0 %v564_v27  ;;  %v1064_v32 = vpop.f32.mrf.mxu0  ;;  %v1070_v34 = vpop.f32.mrf.mxu1 }
  0xec   : > { %v558_v33 = vmul.f32 0.25, %v500_v29  ;;  %v559_v35 = vmul.f32 0.25, %v551_v31 }
  0xed   : > { %v502_v36 = vpop.f32.mrf.mxu0  ;;  %v553_v37 = vpop.f32.mrf.mxu1 }
  0xee   : > { %v567_v38 = vsel %vm560_vm2, %v558_v33, -inf  ;;  %v570_v41 = vsel %vm560_vm2, %v559_v35, -inf }
  0xef   : > { %568 = vmax.xlane.f32.xlu1 %v567_v38  ;;  %v1065_v39 = vpop.f32.mrf.mxu0  ;;  %v1071_v40 = vpop.f32.mrf.mxu1 }
  0xf3   : > { %571 = vmax.xlane.f32.xlu1 %v570_v41 }
 0x170   : > { %v563_v42 = vpop.xlane.xlu0 %562 }
 0x171   : > { %v573_v43 = vsub.f32 %v556_v19, %v563_v42 }
 0x173   : > { %v577_v44 = vmul.f32 1.442695, %v573_v43 }
 0x174   : > { %v566_v45 = vpop.xlane.xlu0 %565 }
 0x175   : > { %1163 = vpow2.f32 %v577_v44  ;;  %v574_v46 = vsub.f32 %v557_v21, %v566_v45 }
 0x177   : > { %v579_v47 = vmul.f32 1.442695, %v574_v46 }
 0x178   : > { %v569_v48 = vpop.xlane.xlu1 %568 }
 0x179   : > { %1165 = vpow2.f32 %v579_v47  ;;  %v575_v49 = vsub.f32 %v558_v33, %v569_v48 }
 0x17b   : > { %v581_v50 = vmul.f32 1.442695, %v575_v49 }
 0x17c   : > { %v572_v51 = vpop.xlane.xlu1 %571 }
 0x17d   : > { %1167 = vpow2.f32 %v581_v50  ;;  %v576_v52 = vsub.f32 %v559_v35, %v572_v51 }
 0x17f   : > { %v583_v53 = vmul.f32 1.442695, %v576_v52 }
 0x181   : > { %1169 = vpow2.f32 %v583_v53 }
 0x182   : > { %v1164_v54 = vpop.eup %1163 }
 0x183   : > { %v585_v55 = vsel %vm560_vm2, %v1164_v54, 0.0 }
 0x184   : > { %586 = vadd.xlane.f32.xlu0 %v585_v55 }
 0x186   : > { %v1166_v56 = vpop.eup %1165 }
 0x187   : > { %v588_v57 = vsel %vm560_vm2, %v1166_v56, 0.0 }
 0x188   : > { %589 = vadd.xlane.f32.xlu1 %v588_v57 }
 0x18a   : > { %v1168_v58 = vpop.eup %1167 }
 0x18b   : > { %v591_v59 = vsel %vm560_vm2, %v1168_v58, 0.0 }
 0x18c   : > { %592 = vadd.xlane.f32.xlu0 %v591_v59 }
 0x18e   : > { %v1170_v60 = vpop.eup %1169 }
 0x18f   : > { %v594_v61 = vsel %vm560_vm2, %v1170_v60, 0.0 }
 0x190   : > { %595 = vadd.xlane.f32.xlu1 %v594_v61 }
 0x20d   : > { %v587_v1 = vpop.xlane.xlu0 %586 }
 0x20e   : > { %1171 = vrcp.f32 %v587_v1 }
 0x211   : > { %v590_v2 = vpop.xlane.xlu1 %589 }
 0x212   : > { %1173 = vrcp.f32 %v590_v2 }
 0x215   : > { %v593_v3 = vpop.xlane.xlu0 %592 }
 0x216   : > { %1175 = vrcp.f32 %v593_v3 }
 0x219   : > { %v596_v4 = vpop.xlane.xlu1 %595 }
 0x21a   : > { %1177 = vrcp.f32 %v596_v4 }
 0x21b   : > { %v1172_v5 = vpop.eup %1171 }
 0x21c   : > { %v601_v6 = vmul.f32 %v1172_v5, %v1164_v54 }
 0x21e   : > { %605 = vst.msk [vmem:[%s293_s10] sm:$0xff] %vm560_vm2, %v601_v6  ;;  %v609_v8 = vpack.c.bf16 %v601_v6, %v601_v6 }
 0x21f   : > { %v1174_v9 = vpop.eup %1173 }
 0x220   : > { %1075 = vmatmul.mubr.msk.bf16.vlgmr.msra.gmra.mxu0 %vm560_vm2, %v609_v8  ;;  %v602_v10 = vmul.f32 %v1174_v9, %v1166_v56 }
 0x221   : > { %1085 = vmatpush3.bf16.msra.mxu0 %v1161_v7  ;;  %1086 = vmatprep.mubr.msk.bf16.mxu0 %vm1258_vm0, %v1257_v0 }
 0x222   : > { %606 = vst.msk [vmem:[%s293_s10 + $0x8] sm:$0xff] %vm560_vm2, %v602_v10  ;;  %v610_v12 = vpack.c.bf16 %v602_v10, %v602_v10 }
 0x223   : > { %v1176_v13 = vpop.eup %1175 }
 0x224   : > { %v603_v14 = vmul.f32 %v1176_v13, %v1168_v58  ;;  %1081 = vmatmul.mubr.msk.bf16.vlgmr.msra.gmra.mxu1 %vm560_vm2, %v610_v12 }
 0x225   : > { %1091 = vmatpush3.bf16.msra.mxu1 %v1162_v11  ;;  %1092 = vmatprep.mubr.msk.bf16.mxu1 %vm1258_vm0, %v1257_v0 }
 0x226   : > { %607 = vst.msk [vmem:[%s293_s10 + $0x10] sm:$0xff] %vm560_vm2, %v603_v14  ;;  %v611_v15 = vpack.c.bf16 %v603_v14, %v603_v14 }
 0x227   : > { %v1178_v16 = vpop.eup %1177 }
 0x228   : > { %v604_v17 = vmul.f32 %v1178_v16, %v1170_v60  ;;  %1087 = vmatmul.mubr.msk.bf16.vlgmr.msra.gmra.mxu0 %vm560_vm2, %v611_v15 }
 0x22a   : > { %608 = vst.msk [vmem:[%s293_s10 + $0x18] sm:$0xff] %vm560_vm2, %v604_v17  ;;  %v612_v18 = vpack.c.bf16 %v604_v17, %v604_v17 }
 0x22c   : > { %1093 = vmatmul.mubr.msk.bf16.vlgmr.msra.gmra.mxu1 %vm560_vm2, %v612_v18 }
 0x22d   : > { %1192 = shalt.err (!%p1189_p5)
}
 0x22e   : > { %s1193_s29 = scalar_lea.hbm %s1429_s16, 512  ;;  %s1197_s10 = scalar_lea.hbm %s1494_s5, 1024 }
 0x22f   : > { %p1194_p6 = scmp.ne.s32.totalorder %s1429_s16, %s1193_s29  ;;  %p1198_p10 = scmp.lt.s32.totalorder %s1429_s16, %s1494_s5 }
 0x230   : > { %p1199_p11 = scmp.lt.s32.totalorder %s1197_s10, %s1193_s29 }
 0x231   : > { %p1195_p7 = pnand %p1194_p6, %p1332_p4 }
 0x232   : > { %p1200_p12 = por %p1199_p11, %p1198_p10 }
 0x233   : > { %p1196_p9 = pneg %p1195_p7 }
 0x235   : > { %p1201_p13 = pnand %p1200_p12, %p1196_p9 }
 0x237   : > { %1204 = shalt.err (!%p1201_p13)
}
 0x238   : > { %s1260_s15 = smov 128   ;;  %s1261_s24 = smov 8   ;;  %vm813_vm3 = vcmask 60416  }
 0x239   : > { %1096 = dma.vmem_to_hbm [thread:$0]  (%p1332_p4), %s1431_s13, 512, %s1429_s16, %s1435_s17, %s1260_s15, %s1260_s15, %s1261_s24  }
 0x23a   : > { %s322_s27 = scalar_lea.vmem %s1493_s4, %s1027_s12 }
 0x2e0   : > { %v656_v0 = vpop.f32.mrf.mxu0 }
 0x2e1   : > { %v809_v19 = vpack.c.bf16 %v656_v0, %v656_v0 }
 0x2e2   : > { %v1076_v20 = vpop.f32.mrf.mxu0 }
 0x2e3   : > { %814 = vst.msk [vmem:[%s322_s27] sm:$0xf] %vm813_vm3, %v809_v19 }
 0x2e4   : > { %v659_v21 = vpop.f32.mrf.mxu0  ;;  %v705_v22 = vpop.f32.mrf.mxu1 }
 0x2e5   : > { %v810_v23 = vpack.c.bf16 %v705_v22, %v705_v22 }
 0x2e6   : > { %v1077_v24 = vpop.f32.mrf.mxu0  ;;  %v1082_v25 = vpop.f32.mrf.mxu1 }
 0x2e7   : > { %815 = vst.msk [vmem:[%s322_s27 + $0x4] sm:$0xf] %vm813_vm3, %v810_v23 }
 0x2e8   : > { %v708_v26 = vpop.f32.mrf.mxu1  ;;  %v754_v27 = vpop.f32.mrf.mxu0 }
 0x2e9   : > { %v811_v28 = vpack.c.bf16 %v754_v27, %v754_v27 }
 0x2ea   : > { %v1083_v29 = vpop.f32.mrf.mxu1  ;;  %v1088_v30 = vpop.f32.mrf.mxu0 }
 0x2eb   : > { %816 = vst.msk [vmem:[%s322_s27 + $0x8] sm:$0xf] %vm813_vm3, %v811_v28 }
 0x2ec   : > { %v757_v31 = vpop.f32.mrf.mxu0  ;;  %v803_v32 = vpop.f32.mrf.mxu1 }
 0x2ed   : > { %v812_v33 = vpack.c.bf16 %v803_v32, %v803_v32 }
 0x2ee   : > { %v1089_v34 = vpop.f32.mrf.mxu0  ;;  %v1094_v35 = vpop.f32.mrf.mxu1 }
 0x2ef   : > { %817 = vst.msk [vmem:[%s322_s27 + $0xc] sm:$0xf] %vm813_vm3, %v812_v33 }
 0x2f0   : > { %v806_v36 = vpop.f32.mrf.mxu1 }
 0x2f2   : > { %v1095_v37 = vpop.f32.mrf.mxu1 }
 0x2f3 PF: > { %p1102_p4 = scmp.ge.s32.totalorder %s1255_s23, 2  ;;  %s870_s28 = sand.u32 1, %s1235_s18  }
 0x2f4   : > { %s871_s7 = scalar_lea.sflag [#allocation3], %s870_s28 }
 0x2f5   : > { %p1099_p0 = pnand %p1102_p4, %p1339_p8 }
 0x2f7   : > { %p1100_p1 = pneg %p1099_p0 }
 0x2f9   : > { %1230 = dma.done.wait (%p1100_p1), %s871_s7, 512  }
 0x2fa   : > { %1232 = vsyncadd (%p1100_p1), %s871_s7, 4294966784  ;;  %s19_s23 = sadd.s32 1, %s1255_s23   ;;  %s1497_s18 = smov %s1239_s19 }
 0x2fb   : > { %p16_p2 = scmp.ge.s32.totalorder %s19_s23, 4   ;;  %s1498_s19 = smov %s1243_s20 }
 0x2fc   : > { %s1499_s20 = smov %s1345_s6  ;;  %s1500_s21 = smov %s1251_s22 }
 0x2fd   : > { %s1501_s22 = smov %s1503_s26  ;;  %18 = sbr.rel (!%p16_p2) target bundleno = 4 (0x4), region = 92 }
 0x302   :  { %876 = vsyncpa [#allocation3], 1 }
 0x303   :  { %878 = vsyncpa [#allocation3 + $0x1], 1 }

// kernel: transformer_decoder.31
= control target key start
LH: loop header
LB: loop body
LE: loop exit
PB: predicated region body
PF: predicated region fallthrough
CT: control target
= control target key end

     0   :  { %v360_v1 = vmov 0.0   ;;  %vm361_vm0 = vmmov 0   ;;  %vm32_vm1 = vcmask 261120   ;;  %s455_s0 = inlined_call_operand.vmem [shape: f32[16,32], index: 0, kind: input, shape index: {}]   ;;  %s456_s1 = inlined_call_operand.vmem [shape: bf16[32,64], index: 1, kind: input, shape index: {}]   ;;  %s457_s2 = inlined_call_operand.vmem [shape: f32[1,64], index: 2, kind: input, shape index: {}]   ;;  %s458_s3 = inlined_call_operand.vmem [shape: bf16[64,32], index: 3, kind: input, shape index: {}]   ;;  %s459_s4 = inlined_call_operand.vmem [shape: f32[1,32], index: 4, kind: input, shape index: {}]   ;;  %s460_s5 = inlined_call_operand.vmem [shape: f32[1,32], index: 5, kind: input, shape index: {}]   ;;  %s461_s6 = inlined_call_operand.vmem [shape: f32[1,32], index: 6, kind: input, shape index: {}]   ;;  %s462_s7 = inlined_call_operand.hbm [shape: f32[16,32], index: 7, kind: output, shape index: {}]  }
   0x1   :  { %v324_v0 = vld [vmem:[%s456_s1 + $0x8] sm:$0xff]   ;;  %299 = vmatprep.subr.bf16.mxu0 %v360_v1  ;;  %307 = vmatprep.subr.bf16.mxu1 %v360_v1  ;;  %v325_v2 = vld [vmem:[%s456_s1] sm:$0xff]   ;;  %33 = vst.msk [vmem:[#allocation2] sm:$0xff] %vm32_vm1, %v360_v1  ;;  %34 = vst.msk [vmem:[#allocation2 + $0x8] sm:$0xff] %vm32_vm1, %v360_v1 }
   0x2   :  { %300 = vmatpush3.bf16.msra.mxu0 %v324_v0  ;;  %303 = vmatprep.mubr.msk.bf16.mxu0 %vm361_vm0, %v360_v1  ;;  %v35_v3 = vld [vmem:[%s455_s0] sm:$0xff]  ;;  %v36_v4 = vld [vmem:[%s455_s0 + $0x8] sm:$0xff] }
   0x3   :  { %301 = vmatprep.subr.bf16.mxu0 %v360_v1  ;;  %315 = vmatprep.mubr.msk.bf16.mxu1 %vm361_vm0, %v360_v1  ;;  %v37_v5 = vpack.c.bf16 %v36_v4, %v35_v3 }
   0x4   :  { %12 = vsyncpa [#allocation4], 0  ;;  %v326_v6 = vld [vmem:[%s458_s3 + $0x18] sm:$0xff]   ;;  %v327_v7 = vld [vmem:[%s458_s3 + $0x10] sm:$0xff]   ;;  %vm151_vm2 = vcmask 523264   ;;  %s362_s20 = smov [#allocation3]  }
   0x5   :  { %308 = vmatpush3.bf16.msra.mxu1 %v326_v6  ;;  %v328_v8 = vld [vmem:[%s458_s3 + $0x8] sm:$0xff]   ;;  %v329_v9 = vld [vmem:[%s458_s3] sm:$0xff]   ;;  %s268_s21 = sshll.u32 %s362_s20, 4  ;;  %s269_s21 = int_to_ptr.vmem [resolvable:$true] %s268_s21 }
   0x6   :  { %302 = vmatpush3.bf16.msra.mxu0 %v325_v2  ;;  %309 = vmatprep.subr.bf16.mxu1 %v360_v1  ;;  %v279_v10 = vld [vmem:[%s457_s2] ss:$0 sm:$0xff]  ;;  %s338_s22 = scalar_lea.vmem %s269_s21, 256  ;;  %p343_p1 = scmp.lt.s32.totalorder %s269_s21, %s269_s21 }
   0x7   :  { %v288_v36 = vld [vmem:[%s459_s4] ss:$0 sm:$0xff]  ;;  %p339_p0 = scmp.ne.s32.totalorder %s269_s21, %s338_s22  ;;  %p344_p2 = scmp.lt.s32.totalorder %s338_s22, %s338_s22 }
   0x8   :  { %v116_v28 = vld [vmem:[#allocation2] sm:$0xff]  ;;  %v117_v32 = vld [vmem:[#allocation2 + $0x8] sm:$0xff] }
   0x9   :  { %304 = vmatmul.mubr.msk.bf16.vlgmr.msra.gmra.mxu0 %vm32_vm1, %v37_v5  ;;  %310 = vmatpush3.bf16.msra.mxu1 %v327_v7  ;;  %v289_v62 = vld [vmem:[%s460_s5] ss:$0 sm:$0xff]  ;;  %p345_p3 = por %p344_p2, %p343_p1 }
   0xa   :  { %311 = vmatprep.subr.bf16.mxu1 %v360_v1  ;;  %v290_v0 = vld [vmem:[%s461_s6] ss:$0 sm:$0xff] }
   0xb   :  { %p346_p4 = pnand %p345_p3, %p339_p0 }
   0xd   :  { %312 = vmatpush3.bf16.msra.mxu1 %v328_v8 }
   0xe   :  { %313 = vmatprep.subr.bf16.mxu1 %v360_v1 }
  0x11   :  { %314 = vmatpush3.bf16.msra.mxu1 %v329_v9 }
  0xc9   :  { %v99_v11 = vpop.f32.mrf.mxu0 }
  0xca   :  { %v100_v12 = vadd.f32 %v279_v10, %v99_v11 }
  0xcb   :  { %v305_v13 = vpop.f32.mrf.mxu0 }
  0xcc   :  { %v108_v14 = vmul.f32 0.70710677, %v100_v12  ;;  %v106_v22 = vmul.f32 0.5, %v100_v12 }
  0xcd   :  { %v102_v15 = vpop.f32.mrf.mxu0 }
  0xce   :  { %330 = verf.f32 %v108_v14  ;;  %v103_v16 = vadd.f32 %v279_v10, %v102_v15 }
  0xcf   :  { %v306_v17 = vpop.f32.mrf.mxu0 }
  0xd0   :  { %v109_v18 = vmul.f32 0.70710677, %v103_v16  ;;  %v107_v23 = vmul.f32 0.5, %v103_v16 }
  0xd2   :  { %332 = verf.f32 %v109_v18 }
  0xdb   :  { %v331_v19 = vpop.eup %330 }
  0xdc   :  { %v112_v20 = vadd.f32 1.0, %v331_v19 }
  0xde   :  { %v114_v25 = vmul.f32 %v112_v20, %v106_v22 }
  0xdf   :  { %v333_v21 = vpop.eup %332 }
  0xe0   :  { %v113_v24 = vadd.f32 1.0, %v333_v21 }
  0xe2   :  { %v115_v26 = vmul.f32 %v113_v24, %v107_v23 }
  0xe4   :  { %v118_v27 = vpack.c.bf16 %v115_v26, %v114_v25 }
  0xe6   :  { %316 = vmatmul.mubr.msk.bf16.vlgmr.msra.gmra.mxu1 %vm151_vm2, %v118_v27 }
 0x1a6   :  { %v189_v29 = vpop.f32.mrf.mxu1 }
 0x1a7   :  { %v196_v30 = vadd.f32 %v189_v29, %v116_v28 }
 0x1a8   :  { %v317_v31 = vpop.f32.mrf.mxu1 }
 0x1a9   :  { %198 = vst.msk [vmem:[#allocation2] sm:$0xff] %vm32_vm1, %v196_v30 }
 0x1aa   :  { %v192_v33 = vpop.f32.mrf.mxu1 }
 0x1ab   :  { %v197_v34 = vadd.f32 %v192_v33, %v117_v32 }
 0x1ac   :  { %v318_v35 = vpop.f32.mrf.mxu1 }
 0x1ad   :  { %199 = vst.msk [vmem:[#allocation2 + $0x8] sm:$0xff] %vm32_vm1, %v197_v34 }
 0x1b0   :  { %v203_v37 = vld [vmem:[#allocation2] sm:$0xff] }
 0x1b1   :  { %v212_v38 = vadd.f32 %v288_v36, %v203_v37 }
 0x1b3   :  { %v214_v39 = vadd.f32 %v212_v38, %v35_v3 }
 0x1b4   :  { %v204_v40 = vld [vmem:[#allocation2 + $0x8] sm:$0xff] }
 0x1b5   :  { %v216_v41 = vsel %vm32_vm1, %v214_v39, 0.0  ;;  %v213_v42 = vadd.f32 %v288_v36, %v204_v40 }
 0x1b6   :  { %217 = vadd.xlane.f32.xlu0 %v216_v41 }
 0x1b7   :  { %v215_v43 = vadd.f32 %v213_v42, %v36_v4 }
 0x1b9   :  { %v219_v44 = vsel %vm32_vm1, %v215_v43, 0.0 }
 0x1ba   :  { %220 = vadd.xlane.f32.xlu0 %v219_v44 }
 0x23f   :  { %v218_v45 = vpop.xlane.xlu0 %217 }
 0x240   :  { %v223_v46 = vmul.f32 0.03125, %v218_v45 }
 0x242   :  { %v225_v47 = vsub.f32 %v214_v39, %v223_v46 }
 0x243   :  { %v221_v48 = vpop.xlane.xlu0 %220 }
 0x244   :  { %v224_v49 = vmul.f32 0.03125, %v221_v48  ;;  %v227_v50 = vmul.f32 %v225_v47, %v225_v47 }
 0x246   :  { %v226_v51 = vsub.f32 %v215_v43, %v224_v49  ;;  %v229_v52 = vsel %vm32_vm1, %v227_v50, 0.0 }
 0x247   :  { %230 = vadd.xlane.f32.xlu1 %v229_v52 }
 0x248   :  { %v228_v53 = vmul.f32 %v226_v51, %v226_v51 }
 0x24a   :  { %v232_v54 = vsel %vm32_vm1, %v228_v53, 0.0 }
 0x24b   :  { %233 = vadd.xlane.f32.xlu1 %v232_v54 }
 0x2d0   :  { %v231_v55 = vpop.xlane.xlu1 %230 }
 0x2d1   :  { %v235_v56 = vmul.f32 0.03125, %v231_v55 }
 0x2d3   :  { %v237_v57 = vadd.f32 1e-05, %v235_v56 }
 0x2d4   :  { %v234_v58 = vpop.xlane.xlu1 %233 }
 0x2d5   :  { %334 = vrsqrt.f32 %v237_v57  ;;  %v236_v59 = vmul.f32 0.03125, %v234_v58 }
 0x2d7   :  { %v238_v60 = vadd.f32 1e-05, %v236_v59 }
 0x2d9   :  { %336 = vrsqrt.f32 %v238_v60 }
 0x2e2   :  { %v335_v61 = vpop.eup %334 }
 0x2e3   :  { %v241_v63 = vmul.f32 %v335_v61, %v225_v47 }
 0x2e5   :  { %v250_v1 = vmul.f32 %v289_v62, %v241_v63 }
 0x2e6   :  { %v337_v2 = vpop.eup %336 }
 0x2e7   :  { %v242_v3 = vmul.f32 %v337_v2, %v226_v51  ;;  %v259_v4 = vadd.f32 %v290_v0, %v250_v1 }
 0x2e9   :  { %v251_v5 = vmul.f32 %v289_v62, %v242_v3  ;;  %261 = vst.msk [vmem:[#allocation3] sm:$0xff] %vm32_vm1, %v259_v4 }
 0x2eb   :  { %v260_v6 = vadd.f32 %v290_v0, %v251_v5 }
 0x2ed   :  { %262 = vst.msk [vmem:[#allocation3 + $0x8] sm:$0xff] %vm32_vm1, %v260_v6 }
 0x2ee   :  { %349 = shalt.err (!%p346_p4)
}
 0x2ef   :  { %s363_s5 = smov 128   ;;  %s364_s6 = smov 8  }
 0x2f0   :  { %274 = dma.vmem_to_hbm [thread:$0]  %s269_s21, 256, %s462_s7, [#allocation4], %s363_s5, %s363_s5, %s364_s6  }
 0x2f1   :  { %358 = dma.done.wait [#allocation4], 256  }
 0x2f2   :  { %359 = vsyncadd [#allocation4], 4294967040 }
 0x2f3   :  { %278 = vsyncpa [#allocation4], 1 }

</bundles_post_ra>
